<compile_context>
chip_gen: v6e
topology: v6e:2x2x1
jax: 0.10.0
libtpu: 0.0.40
codegen_flags: <defaults>
</compile_context>

<pallas_src>
import functools
import numpy as np
import jax
import jax.numpy as jnp
from jax.experimental import pallas as pl
from jax.experimental.pallas import tpu as pltpu

# Stays under v7x's 64 MiB physical VMEM per TensorCore; plenty on v5e/v6e.
_VMEM_LIMIT = 48 * 1024 * 1024


# ----------------------------------------------------------------------------
# Pallas kernels
# ----------------------------------------------------------------------------

def _matmul_bias_kernel(a_ref, b_ref, bias_ref, o_ref, *, relu):
    acc = jnp.dot(a_ref[...], b_ref[...], preferred_element_type=jnp.float32)
    acc = acc + bias_ref[...]
    if relu:
        acc = jnp.maximum(acc, 0.0)
    o_ref[...] = acc


def _bn_affine(x, g, b):
    # x: (R, C) with C lane-dense; batch stats per channel over rows (axis 0).
    mean = jnp.mean(x, axis=0, keepdims=True)
    var = jnp.mean(jnp.square(x - mean), axis=0, keepdims=True)
    return (x - mean) * jax.lax.rsqrt(var + 1e-5) * g + b


def _bn_kernel(x_ref, g_ref, b_ref, o_ref, *, relu):
    y = _bn_affine(x_ref[...], g_ref[...], b_ref[...])
    if relu:
        y = jnp.maximum(y, 0.0)
    o_ref[...] = y


def _bn_res_kernel(x_ref, r_ref, g_ref, b_ref, o_ref, *, relu):
    # Fused BatchNorm + residual add (+ ReLU): relu(BN(x) + res).
    y = _bn_affine(x_ref[...], g_ref[...], b_ref[...]) + r_ref[...]
    if relu:
        y = jnp.maximum(y, 0.0)
    o_ref[...] = y


def _gn_affine(x, a, g, b):
    # x: (HW, C). a: (C, C) block-diagonal averaging matrix
    # (1/(group_size*HW) within a group) -> group stats come out already
    # broadcast per channel, so everything stays lane-dense.
    mean = jnp.dot(jnp.sum(x, axis=0, keepdims=True), a,
                   preferred_element_type=jnp.float32)
    d = x - mean
    var = jnp.dot(jnp.sum(d * d, axis=0, keepdims=True), a,
                  preferred_element_type=jnp.float32)
    return d * jax.lax.rsqrt(var + 1e-5) * g + b


def _gn_kernel(x_ref, a_ref, g_ref, b_ref, o_ref):
    o_ref[0] = _gn_affine(x_ref[0], a_ref[...], g_ref[...], b_ref[...])


def _gn_res_kernel(x_ref, r_ref, a_ref, g_ref, b_ref, o_ref):
    # Fused GroupNorm + residual add: GN(x) + res.
    o_ref[0] = _gn_affine(x_ref[0], a_ref[...], g_ref[...], b_ref[...]) + r_ref[0]


def _binary_kernel(a_ref, b_ref, o_ref, *, op):
    a = a_ref[...]
    b = b_ref[...]
    if op == "add":
        o_ref[...] = a + b
    elif op == "add_relu":
        o_ref[...] = jnp.maximum(a + b, 0.0)
    else:  # "mul"
        o_ref[...] = a * b


def _max9_kernel(*refs):
    # 9 shifted views of the padded input, one output; pure VPU max tree.
    o_ref = refs[-1]
    m = refs[0][...]
    for r in refs[1:-1]:
        m = jnp.maximum(m, r[...])
    o_ref[...] = m


def _gap_conv_kernel(x_ref, w_ref, b_ref, o_ref):
    # AdaptiveAvgPool2d((1,1)) + 1x1 conv, one sample per grid step.
    xm = jnp.mean(x_ref[0], axis=0, keepdims=True)          # (1, Cin)
    o_ref[0] = jnp.dot(xm, w_ref[...],
                       preferred_element_type=jnp.float32) + b_ref[...]


def _scale_rows_kernel(x_ref, s_ref, o_ref):
    o_ref[0] = x_ref[0] * s_ref[0]


# ----------------------------------------------------------------------------
# Pallas wrappers
# ----------------------------------------------------------------------------

def _round_up(x, m):
    return ((x + m - 1) // m) * m


def pallas_matmul_bias(a, b, bias, relu=False):
    """relu?(a @ b + bias). bf16 MXU inputs, f32 accumulation, (M,N) grid."""
    M, K = a.shape
    _, N = b.shape
    Mp = _round_up(max(M, 8), 8)
    Kp = _round_up(max(K, 128), 128)
    Np = _round_up(max(N, 128), 128)
    a_p = jnp.pad(a.astype(jnp.float32), ((0, Mp - M), (0, Kp - K))).astype(jnp.bfloat16)
    b_p = jnp.pad(b.astype(jnp.float32), ((0, Kp - K), (0, Np - N))).astype(jnp.bfloat16)
    bias_p = jnp.pad(bias.astype(jnp.float32).reshape(1, N), ((0, 0), (0, Np - N)))
    tm = 256 if Mp % 256 == 0 else (128 if Mp % 128 == 0 else Mp)
    tn = 512 if Np % 512 == 0 else (256 if Np % 256 == 0 else 128)
    out = pl.pallas_call(
        functools.partial(_matmul_bias_kernel, relu=relu),
        out_shape=jax.ShapeDtypeStruct((Mp, Np), jnp.float32),
        grid=(Mp // tm, Np // tn),
        in_specs=[pl.BlockSpec((tm, Kp), lambda i, j: (i, 0)),
                  pl.BlockSpec((Kp, tn), lambda i, j: (0, j)),
                  pl.BlockSpec((1, tn), lambda i, j: (0, j))],
        out_specs=pl.BlockSpec((tm, tn), lambda i, j: (i, j)),
        compiler_params=pltpu.CompilerParams(
            dimension_semantics=("parallel", "parallel"),
            vmem_limit_bytes=_VMEM_LIMIT),
    )(a_p, b_p, bias_p)
    return out[:M, :N]


def pallas_batchnorm(x, gamma, beta, relu=False, residual=None):
    """Train-mode BatchNorm2d (+optional fused residual add and ReLU), NHWC."""
    N, H, W, C = x.shape
    R = N * H * W
    x2 = x.reshape(R, C).astype(jnp.float32)
    g = gamma.reshape(1, C)
    b = beta.reshape(1, C)
    if residual is None:
        out = pl.pallas_call(
            functools.partial(_bn_kernel, relu=relu),
            out_shape=jax.ShapeDtypeStruct((R, C), jnp.float32),
            grid=(1,),
            in_specs=[pl.BlockSpec((R, C), lambda i: (0, 0)),
                      pl.BlockSpec((1, C), lambda i: (0, 0)),
                      pl.BlockSpec((1, C), lambda i: (0, 0))],
            out_specs=pl.BlockSpec((R, C), lambda i: (0, 0)),
        )(x2, g, b)
    else:
        r2 = residual.reshape(R, C).astype(jnp.float32)
        out = pl.pallas_call(
            functools.partial(_bn_res_kernel, relu=relu),
            out_shape=jax.ShapeDtypeStruct((R, C), jnp.float32),
            grid=(1,),
            in_specs=[pl.BlockSpec((R, C), lambda i: (0, 0)),
                      pl.BlockSpec((R, C), lambda i: (0, 0)),
                      pl.BlockSpec((1, C), lambda i: (0, 0)),
                      pl.BlockSpec((1, C), lambda i: (0, 0))],
            out_specs=pl.BlockSpec((R, C), lambda i: (0, 0)),
        )(x2, r2, g, b)
    return out.reshape(N, H, W, C)


def pallas_groupnorm(x, gamma, beta, groups=32, residual=None):
    """GroupNorm(32) with affine (nn.GroupNorm semantics), per-sample grid.

    If `residual` is given, returns GN(x) + residual in the same kernel.
    """
    N, H, W, C = x.shape
    HW = H * W
    cg = C // groups
    gidx = np.arange(C) // cg
    amat = jnp.asarray((gidx[:, None] == gidx[None, :]).astype(np.float32)
                       / float(cg * HW))
    x3 = x.reshape(N, HW, C).astype(jnp.float32)
    g = gamma.reshape(1, C)
    b = beta.reshape(1, C)
    if residual is None:
        out = pl.pallas_call(
            _gn_kernel,
            out_shape=jax.ShapeDtypeStruct((N, HW, C), jnp.float32),
            grid=(N,),
            in_specs=[pl.BlockSpec((1, HW, C), lambda n: (n, 0, 0)),
                      pl.BlockSpec((C, C), lambda n: (0, 0)),
                      pl.BlockSpec((1, C), lambda n: (0, 0)),
                      pl.BlockSpec((1, C), lambda n: (0, 0))],
            out_specs=pl.BlockSpec((1, HW, C), lambda n: (n, 0, 0)),
            compiler_params=pltpu.CompilerParams(dimension_semantics=("parallel",)),
        )(x3, amat, g, b)
    else:
        r3 = residual.reshape(N, HW, C).astype(jnp.float32)
        out = pl.pallas_call(
            _gn_res_kernel,
            out_shape=jax.ShapeDtypeStruct((N, HW, C), jnp.float32),
            grid=(N,),
            in_specs=[pl.BlockSpec((1, HW, C), lambda n: (n, 0, 0)),
                      pl.BlockSpec((1, HW, C), lambda n: (n, 0, 0)),
                      pl.BlockSpec((C, C), lambda n: (0, 0)),
                      pl.BlockSpec((1, C), lambda n: (0, 0)),
                      pl.BlockSpec((1, C), lambda n: (0, 0))],
            out_specs=pl.BlockSpec((1, HW, C), lambda n: (n, 0, 0)),
            compiler_params=pltpu.CompilerParams(dimension_semantics=("parallel",)),
        )(x3, r3, amat, g, b)
    return out.reshape(N, H, W, C)


def pallas_binary(a, b, op):
    """Elementwise add / add+relu / mul with C lane-dense (row-tiled if big)."""
    shp = a.shape
    C = shp[-1]
    a2 = a.reshape(-1, C).astype(jnp.float32)
    b2 = b.reshape(-1, C).astype(jnp.float32)
    R = a2.shape[0]
    tr = 512 if (R > 512 and R % 512 == 0 and C % 128 == 0) else R
    out = pl.pallas_call(
        functools.partial(_binary_kernel, op=op),
        out_shape=jax.ShapeDtypeStruct((R, C), jnp.float32),
        grid=(R // tr,),
        in_specs=[pl.BlockSpec((tr, C), lambda i: (i, 0)),
                  pl.BlockSpec((tr, C), lambda i: (i, 0))],
        out_specs=pl.BlockSpec((tr, C), lambda i: (i, 0)),
        compiler_params=pltpu.CompilerParams(dimension_semantics=("parallel",)),
    )(a2, b2)
    return out.reshape(shp)


def pallas_maxpool_3x3_s2_p1(x):
    """MaxPool2d(kernel=3, stride=2, padding=1) on NHWC."""
    N, H, W, C = x.shape
    OH = (H + 2 - 3) // 2 + 1
    OW = (W + 2 - 3) // 2 + 1
    xp = jnp.pad(x.astype(jnp.float32), ((0, 0), (1, 1), (1, 1), (0, 0)),
                 constant_values=float("-inf"))
    R = N * OH * OW
    views = [xp[:, kh:kh + (OH - 1) * 2 + 1:2,
                  kw:kw + (OW - 1) * 2 + 1:2, :].reshape(R, C)
             for kh in range(3) for kw in range(3)]
    out = pl.pallas_call(
        _max9_kernel,
        out_shape=jax.ShapeDtypeStruct((R, C), jnp.float32),
        grid=(1,),
        in_specs=[pl.BlockSpec((R, C), lambda i: (0, 0))] * 9,
        out_specs=pl.BlockSpec((R, C), lambda i: (0, 0)),
    )(*views)
    return out.reshape(N, OH, OW, C)


def pallas_gap_conv(x, w_oihw, bias):
    """Fused AdaptiveAvgPool2d((1,1)) + 1x1 Conv2d -> (N, Cout) scales."""
    N, H, W, C = x.shape
    HW = H * W
    Cout = w_oihw.shape[0]
    x3 = x.reshape(N, HW, C).astype(jnp.float32)
    w = jnp.transpose(w_oihw[:, :, 0, 0]).astype(jnp.float32)        # (Cin, Cout)
    b = bias.astype(jnp.float32).reshape(1, Cout)
    out = pl.pallas_call(
        _gap_conv_kernel,
        out_shape=jax.ShapeDtypeStruct((N, 1, Cout), jnp.float32),
        grid=(N,),
        in_specs=[pl.BlockSpec((1, HW, C), lambda n: (n, 0, 0)),
                  pl.BlockSpec((C, Cout), lambda n: (0, 0)),
                  pl.BlockSpec((1, Cout), lambda n: (0, 0))],
        out_specs=pl.BlockSpec((1, 1, Cout), lambda n: (n, 0, 0)),
        compiler_params=pltpu.CompilerParams(dimension_semantics=("parallel",)),
    )(x3, w, b)
    return out.reshape(N, Cout)


def pallas_scale_rows(x, scale):
    """x[n,h,w,c] * scale[n,c] (broadcast multiply), C lane-dense."""
    N, H, W, C = x.shape
    HW = H * W
    x3 = x.reshape(N, HW, C).astype(jnp.float32)
    s3 = scale.reshape(N, 1, C).astype(jnp.float32)
    out = pl.pallas_call(
        _scale_rows_kernel,
        out_shape=jax.ShapeDtypeStruct((N, HW, C), jnp.float32),
        grid=(N,),
        in_specs=[pl.BlockSpec((1, HW, C), lambda n: (n, 0, 0)),
                  pl.BlockSpec((1, 1, C), lambda n: (n, 0, 0))],
        out_specs=pl.BlockSpec((1, HW, C), lambda n: (n, 0, 0)),
        compiler_params=pltpu.CompilerParams(dimension_semantics=("parallel",)),
    )(x3, s3)
    return out.reshape(N, H, W, C)


# ----------------------------------------------------------------------------
# NN building blocks (glue around the Pallas kernels)
# ----------------------------------------------------------------------------

def conv2d(x, w_oihw, bias, stride=1, padding=0, dilation=1, relu=False):
    """PyTorch-semantics Conv2d. x: NHWC, w: OIHW. Optional fused ReLU."""
    N, H, W, Cin = x.shape
    Cout, _, KH, KW = w_oihw.shape
    s, p, d = stride, padding, dilation
    OH = (H + 2 * p - d * (KH - 1) - 1) // s + 1
    OW = (W + 2 * p - d * (KW - 1) - 1) // s + 1
    if bias is None:
        bias = jnp.zeros((Cout,), jnp.float32)
    if KH == 1 and KW == 1 and p == 0:
        # Fast path: 1x1 conv needs no im2col copy.
        xs = x[:, ::s, ::s, :] if s > 1 else x
        a = xs.reshape(N * OH * OW, Cin)
        b = jnp.transpose(w_oihw[:, :, 0, 0])                      # (Cin, Cout)
    else:
        xp = jnp.pad(x, ((0, 0), (p, p), (p, p), (0, 0)))
        patches = []
        for kh in range(KH):
            for kw in range(KW):
                h0, w0 = kh * d, kw * d
                patches.append(xp[:, h0:h0 + (OH - 1) * s + 1:s,
                                   w0:w0 + (OW - 1) * s + 1:s, :])
        a = jnp.concatenate(patches, axis=-1).reshape(N * OH * OW, KH * KW * Cin)
        b = jnp.transpose(w_oihw, (2, 3, 1, 0)).reshape(KH * KW * Cin, Cout)
    out = pallas_matmul_bias(a, b, bias, relu=relu)
    return out.reshape(N, OH, OW, Cout)


def _interp_matrix_np(out_size, in_size):
    Wm = np.zeros((out_size, in_size), np.float32)
    if in_size == 1 or out_size == 1:
        Wm[:, 0] = 1.0
        return Wm
    pos = np.arange(out_size, dtype=np.float64) * (in_size - 1) / (out_size - 1)
    i0 = np.clip(np.floor(pos).astype(np.int64), 0, in_size - 1)
    i1 = np.minimum(i0 + 1, in_size - 1)
    w1 = (pos - i0).astype(np.float32)
    for r in range(out_size):
        Wm[r, i0[r]] += 1.0 - w1[r]
        Wm[r, i1[r]] += w1[r]
    return Wm


def upsample_bilinear_align(x, scale):
    """F.upsample(scale_factor=scale, mode='bilinear', align_corners=True)."""
    N, H, W, C = x.shape
    OH, OW = H * scale, W * scale
    Wh = jnp.asarray(_interp_matrix_np(OH, H))
    Ww = jnp.asarray(_interp_matrix_np(OW, W))
    xt = jnp.transpose(x, (1, 0, 2, 3)).reshape(H, N * W * C)
    y = pallas_matmul_bias(Wh, xt, jnp.zeros((N * W * C,), jnp.float32))
    y = y.reshape(OH, N, W, C).transpose(1, 0, 2, 3)               # (N, OH, W, C)
    yt = jnp.transpose(y, (2, 0, 1, 3)).reshape(W, N * OH * C)
    z = pallas_matmul_bias(Ww, yt, jnp.zeros((N * OH * C,), jnp.float32))
    return z.reshape(OW, N, OH, C).transpose(1, 2, 0, 3)           # (N, OH, OW, C)


# ----------------------------------------------------------------------------
# Deterministic parameter construction (synthetic ResNet-152 + heads)
# ----------------------------------------------------------------------------

class ParamGen:
    def __init__(self, seed=0):
        self.key = jax.random.PRNGKey(seed)
        self.count = 0

    def _next(self):
        self.count += 1
        return jax.random.fold_in(self.key, self.count)

    def conv(self, cout, cin, kh, kw, bias=True):
        fan_in = cin * kh * kw
        w = jax.random.normal(self._next(), (cout, cin, kh, kw),
                              jnp.float32) * np.sqrt(2.0 / fan_in)
        b = None
        if bias:
            bound = 1.0 / np.sqrt(fan_in)
            b = jax.random.uniform(self._next(), (cout,), jnp.float32,
                                   minval=-bound, maxval=bound)
        return {"w": w, "b": b}

    def norm(self, c):   # BN / GN affine (PyTorch default init: weight=1, bias=0)
        return {"gamma": jnp.ones((c,), jnp.float32),
                "beta": jnp.zeros((c,), jnp.float32)}


def make_bottleneck(pg, inplanes, planes, downsample):
    p = {"conv1": pg.conv(planes, inplanes, 1, 1, bias=False), "bn1": pg.norm(planes),
         "conv2": pg.conv(planes, planes, 3, 3, bias=False), "bn2": pg.norm(planes),
         "conv3": pg.conv(planes * 4, planes, 1, 1, bias=False), "bn3": pg.norm(planes * 4)}
    if downsample:
        p["down_conv"] = pg.conv(planes * 4, inplanes, 1, 1, bias=False)
        p["down_bn"] = pg.norm(planes * 4)
    return p


def make_layer(pg, inplanes, planes, blocks):
    layer = [make_bottleneck(pg, inplanes, planes, True)]
    for _ in range(1, blocks):
        layer.append(make_bottleneck(pg, planes * 4, planes, False))
    return layer


def build_params(seed=0):
    pg = ParamGen(seed)
    rp = {"conv1": pg.conv(64, 3, 7, 7, bias=False), "bn1": pg.norm(64),
          "layer1": make_layer(pg, 64, 64, 3),
          "layer2": make_layer(pg, 256, 128, 8),
          "layer3": make_layer(pg, 512, 256, 36),
          "layer4": make_layer(pg, 1024, 512, 3)}
    P = {"resnet": rp,
         "conv3": pg.conv(256, 2048, 1, 1), "conv4": pg.conv(256, 1024, 1, 1),
         "conv5": pg.conv(256, 512, 1, 1), "conv6": pg.conv(256, 256, 1, 1),
         "conv9": pg.conv(256, 256, 3, 3), "conv10": pg.conv(256, 256, 3, 3),
         "conv11": pg.conv(256, 256, 3, 3), "conv12": pg.conv(256, 768, 1, 1),
         "conv_end": pg.conv(21, 256, 1, 1), "bn1": pg.norm(256),
         "fusion": {"bn": pg.norm(256),
                    "conv1": pg.conv(256, 256, 3, 3),
                    "conv2": pg.conv(256, 256, 3, 3),
                    "gap_conv": pg.conv(256, 256, 1, 1)}}
    return P


def build_static_cfg():
    """Static (stride, dilation) per bottleneck — kept out of the jit pytree."""
    def layer_cfg(blocks, stride, dils=None):
        cfg = []
        for i in range(blocks):
            s = stride if i == 0 else 1
            d = 1 if dils is None else dils[i % len(dils)]
            cfg.append((s, d))
        return cfg
    return {"layer1": layer_cfg(3, 1),
            "layer2": layer_cfg(8, 2),
            "layer3": layer_cfg(36, 2, [1, 2, 5, 9]),
            "layer4": layer_cfg(3, 2, [5, 9, 17])}


# ----------------------------------------------------------------------------
# Model forward (block-level jit; identically-shaped blocks share executables)
# ----------------------------------------------------------------------------

@jax.jit
def stem_forward(conv1, bn1, x):
    x = conv2d(x, conv1["w"], None, stride=2, padding=3)
    x = pallas_batchnorm(x, bn1["gamma"], bn1["beta"], relu=True)
    return pallas_maxpool_3x3_s2_p1(x)


@functools.partial(jax.jit, static_argnames=("stride", "dilation"))
def bottleneck_forward(p, x, *, stride, dilation):
    out = conv2d(x, p["conv1"]["w"], None)
    out = pallas_batchnorm(out, p["bn1"]["gamma"], p["bn1"]["beta"], relu=True)
    out = conv2d(out, p["conv2"]["w"], None, stride=stride,
                 padding=dilation, dilation=dilation)
    out = pallas_batchnorm(out, p["bn2"]["gamma"], p["bn2"]["beta"], relu=True)
    out = conv2d(out, p["conv3"]["w"], None)
    if "down_conv" in p:
        residual = conv2d(x, p["down_conv"]["w"], None, stride=stride)
        residual = pallas_batchnorm(residual, p["down_bn"]["gamma"],
                                    p["down_bn"]["beta"], relu=False)
    else:
        residual = x
    # Fused BN3 + residual add + ReLU in one kernel.
    return pallas_batchnorm(out, p["bn3"]["gamma"], p["bn3"]["beta"],
                            relu=True, residual=residual)


@jax.jit
def project_gn(conv_p, gn_p, x):
    y = conv2d(x, conv_p["w"], conv_p["b"])
    return pallas_groupnorm(y, gn_p["gamma"], gn_p["beta"])


@jax.jit
def dense_aspp(ap, x):
    dual = conv2d(x, ap["conv6"]["w"], ap["conv6"]["b"])
    f0 = conv2d(x, ap["conv9"]["w"], ap["conv9"]["b"], padding=7, dilation=7)
    f1 = conv2d(x, ap["conv10"]["w"], ap["conv10"]["b"], padding=11, dilation=11)
    f2 = conv2d(x, ap["conv11"]["w"], ap["conv11"]["b"], padding=13, dilation=13)
    # Reference aliasing: `s += feature_list[i]` doubles s in place, so the
    # concatenated features are [f0, 2*f1, 4*f2].
    dense = jnp.concatenate([f0, 2.0 * f1, 4.0 * f2], axis=-1)
    dense = conv2d(dense, ap["conv12"]["w"], ap["conv12"]["b"], relu=True)
    # Fused GroupNorm + "dual + dense" residual add.
    return pallas_groupnorm(dense, ap["bn1"]["gamma"], ap["bn1"]["beta"],
                            residual=dual)


@jax.jit
def fusion_forward(Fp, low, high):
    low_down = upsample_bilinear_align(low, 2)
    low_down = conv2d(low_down, Fp["conv1"]["w"], Fp["conv1"]["b"], padding=1)
    low2 = conv2d(low, Fp["conv1"]["w"], Fp["conv1"]["b"], padding=1)
    high_up = conv2d(high, Fp["conv2"]["w"], Fp["conv2"]["b"], stride=2, padding=1)
    high2 = conv2d(high, Fp["conv1"]["w"], Fp["conv1"]["b"], padding=1)
    # low = conv1(low) + GN(conv2(high))        (GN + add fused)
    low2 = pallas_groupnorm(high_up, Fp["bn"]["gamma"], Fp["bn"]["beta"],
                            residual=low2)
    # high = GN(conv1(up(low))) + conv1(high)   (GN + add fused)
    high2 = pallas_groupnorm(low_down, Fp["bn"]["gamma"], Fp["bn"]["beta"],
                             residual=high2)
    high2 = conv2d(high2, Fp["conv1"]["w"], Fp["conv1"]["b"], padding=1)
    gap = pallas_gap_conv(low2, Fp["gap_conv"]["w"], Fp["gap_conv"]["b"])  # (N, C)
    return pallas_scale_rows(high2, gap)


@jax.jit
def final_head(conv6_p, conv_end_p, med6, fm1):
    med6 = pallas_binary(conv2d(med6, conv6_p["w"], conv6_p["b"]), fm1, "add")
    out = conv2d(med6, conv_end_p["w"], conv_end_p["b"])
    return upsample_bilinear_align(out, 4)


def extension1_forward(P, cfg, x_nchw):
    x = jnp.transpose(x_nchw.astype(jnp.float32), (0, 2, 3, 1))      # NCHW -> NHWC
    rp = P["resnet"]
    x = stem_forward(rp["conv1"], rp["bn1"], x)
    feats = []
    for lname in ("layer1", "layer2", "layer3", "layer4"):
        for p_blk, (s, d) in zip(rp[lname], cfg[lname]):
            x = bottleneck_forward(p_blk, x, stride=s, dilation=d)
        feats.append(x)
    fm1, fm2, fm3, fm4 = feats

    level1 = project_gn(P["conv6"], P["bn1"], fm1)
    level2 = project_gn(P["conv5"], P["bn1"], fm2)
    fm3c = project_gn(P["conv4"], P["bn1"], fm3)
    fm4c = project_gn(P["conv3"], P["bn1"], fm4)
    ap = {"conv6": P["conv6"], "conv9": P["conv9"], "conv10": P["conv10"],
          "conv11": P["conv11"], "conv12": P["conv12"], "bn1": P["bn1"]}
    level3 = dense_aspp(ap, fm3c)
    level4 = dense_aspp(ap, fm4c)

    Fp = P["fusion"]
    med1 = fusion_forward(Fp, level2, level1)
    med2 = fusion_forward(Fp, level3, level2)
    med3 = fusion_forward(Fp, level4, level3)
    med4 = fusion_forward(Fp, med2, med1)
    med5 = fusion_forward(Fp, med3, med2)
    med6 = fusion_forward(Fp, med5, med4)

    out = final_head(P["conv6"], P["conv_end"], med6, fm1)
    return jnp.transpose(out, (0, 3, 1, 2))                          # NHWC -> NCHW


# ----------------------------------------------------------------------------
if __name__ == "__main__":
    params = build_params(seed=0)
    cfg = build_static_cfg()
    x = jax.random.normal(jax.random.PRNGKey(0), (2, 3, 32, 32), jnp.float32)
    out = extension1_forward(params, cfg, x)
    out = jax.block_until_ready(out)
    assert out.shape == (2, 21, 32, 32), out.shape
    assert bool(jnp.all(jnp.isfinite(out)))
    print("KERNEL_OK")
</pallas_src>

<mosaic_0001>
module attributes {stable_mosaic.version = 11 : i64} {
  func.func @_bn_kernel(%arg0: i32, %arg1: memref<512x64xf32, #tpu.memory_space<vmem>>, %arg2: memref<1x64xf32, #tpu.memory_space<vmem>>, %arg3: memref<1x64xf32, #tpu.memory_space<vmem>>, %arg4: memref<512x64xf32, #tpu.memory_space<vmem>>) attributes {dimension_semantics = [#tpu.dimension_semantics<arbitrary>], iteration_bounds = array<i64: 1>, scalar_prefetch = 0 : i64, scratch_operands = 0 : i64, tpu.core_type = #tpu.core_type<tc>, window_params = [{pipeline_mode = #tpu.pipeline_mode<synchronous>, transform_indices = @transform_0, window_bounds = array<i64: 512, 64>}, {pipeline_mode = #tpu.pipeline_mode<synchronous>, transform_indices = @transform_1, window_bounds = array<i64: 1, 64>}, {pipeline_mode = #tpu.pipeline_mode<synchronous>, transform_indices = @transform_2, window_bounds = array<i64: 1, 64>}, {pipeline_mode = #tpu.pipeline_mode<synchronous>, transform_indices = @transform_3, window_bounds = array<i64: 512, 64>}]} {
    %c0 = arith.constant 0 : index
    %c0_0 = arith.constant 0 : index
    %0 = vector.load %arg1[%c0, %c0_0] : memref<512x64xf32, #tpu.memory_space<vmem>>, vector<512x64xf32>
    %c0_1 = arith.constant 0 : index
    %c0_2 = arith.constant 0 : index
    %1 = vector.load %arg2[%c0_1, %c0_2] : memref<1x64xf32, #tpu.memory_space<vmem>>, vector<1x64xf32>
    %c0_3 = arith.constant 0 : index
    %c0_4 = arith.constant 0 : index
    %2 = vector.load %arg3[%c0_3, %c0_4] : memref<1x64xf32, #tpu.memory_space<vmem>>, vector<1x64xf32>
    %cst = arith.constant dense<0.000000e+00> : vector<64xf32>
    %3 = vector.multi_reduction <add>, %0, %cst [0] : vector<512x64xf32> to vector<64xf32>
    %4 = vector.shape_cast %3 : vector<64xf32> to vector<1x64xf32>
    %cst_5 = arith.constant 5.120000e+02 : f32
    %5 = vector.broadcast %cst_5 : f32 to vector<1x64xf32>
    %6 = arith.divf %4, %5 : vector<1x64xf32>
    %7 = vector.broadcast %6 : vector<1x64xf32> to vector<512x64xf32>
    %8 = arith.subf %0, %7 : vector<512x64xf32>
    %9 = arith.mulf %8, %8 : vector<512x64xf32>
    %cst_6 = arith.constant dense<0.000000e+00> : vector<64xf32>
    %10 = vector.multi_reduction <add>, %9, %cst_6 [0] : vector<512x64xf32> to vector<64xf32>
    %11 = vector.shape_cast %10 : vector<64xf32> to vector<1x64xf32>
    %cst_7 = arith.constant 5.120000e+02 : f32
    %12 = vector.broadcast %cst_7 : f32 to vector<1x64xf32>
    %13 = arith.divf %11, %12 : vector<1x64xf32>
    %14 = vector.broadcast %6 : vector<1x64xf32> to vector<512x64xf32>
    %15 = arith.subf %0, %14 : vector<512x64xf32>
    %cst_8 = arith.constant 9.99999974E-6 : f32
    %16 = vector.broadcast %cst_8 : f32 to vector<1x64xf32>
    %17 = arith.addf %13, %16 : vector<1x64xf32>
    %18 = math.rsqrt %17 : vector<1x64xf32>
    %19 = vector.broadcast %18 : vector<1x64xf32> to vector<512x64xf32>
    %20 = arith.mulf %15, %19 : vector<512x64xf32>
    %21 = vector.broadcast %1 : vector<1x64xf32> to vector<512x64xf32>
    %22 = arith.mulf %20, %21 : vector<512x64xf32>
    %23 = vector.broadcast %2 : vector<1x64xf32> to vector<512x64xf32>
    %24 = arith.addf %22, %23 : vector<512x64xf32>
    %cst_9 = arith.constant 0.000000e+00 : f32
    %25 = vector.broadcast %cst_9 : f32 to vector<512x64xf32>
    %26 = arith.maximumf %24, %25 : vector<512x64xf32>
    %c0_10 = arith.constant 0 : index
    %c0_11 = arith.constant 0 : index
    %27 = vector.load %arg4[%c0_10, %c0_11] : memref<512x64xf32, #tpu.memory_space<vmem>>, vector<512x64xf32>
    tpu.vector_store %arg4[%c0_10, %c0_11], %26 {strides = array<i32>} : memref<512x64xf32, #tpu.memory_space<vmem>>, vector<512x64xf32>,
    return
  }
  func.func @transform_0(%arg0: i32) -> (i32, i32) {
    %c0_i32 = arith.constant 0 : i32
    %c0_i32_0 = arith.constant 0 : i32
    %c0_i32_1 = arith.constant 0 : i32
    return %c0_i32, %c0_i32_0 : i32, i32
  }
  func.func @transform_1(%arg0: i32) -> (i32, i32) {
    %c0_i32 = arith.constant 0 : i32
    %c0_i32_0 = arith.constant 0 : i32
    %c0_i32_1 = arith.constant 0 : i32
    return %c0_i32, %c0_i32_0 : i32, i32
  }
  func.func @transform_2(%arg0: i32) -> (i32, i32) {
    %c0_i32 = arith.constant 0 : i32
    %c0_i32_0 = arith.constant 0 : i32
    %c0_i32_1 = arith.constant 0 : i32
    return %c0_i32, %c0_i32_0 : i32, i32
  }
  func.func @transform_3(%arg0: i32) -> (i32, i32) {
    %c0_i32 = arith.constant 0 : i32
    %c0_i32_0 = arith.constant 0 : i32
    %c0_i32_1 = arith.constant 0 : i32
    return %c0_i32, %c0_i32_0 : i32, i32
  }
}

module attributes {stable_mosaic.version = 11 : i64} {
  func.func @_matmul_bias_kernel(%arg0: i32, %arg1: i32, %arg2: memref<256x256xbf16, #tpu.memory_space<vmem>>, %arg3: memref<256x128xbf16, #tpu.memory_space<vmem>>, %arg4: memref<1x128xf32, #tpu.memory_space<vmem>>, %arg5: memref<256x128xf32, #tpu.memory_space<vmem>>) attributes {dimension_semantics = [#tpu.dimension_semantics<parallel>, #tpu.dimension_semantics<parallel>], iteration_bounds = array<i64: 2, 1>, scalar_prefetch = 0 : i64, scratch_operands = 0 : i64, tpu.core_type = #tpu.core_type<tc>, window_params = [{transform_indices = @transform_0, window_bounds = array<i64: 256, 256>}, {transform_indices = @transform_1, window_bounds = array<i64: 256, 128>}, {transform_indices = @transform_2, window_bounds = array<i64: 1, 128>}, {transform_indices = @transform_3, window_bounds = array<i64: 256, 128>}]} {
    %c0 = arith.constant 0 : index
    %c0_0 = arith.constant 0 : index
    %0 = vector.load %arg2[%c0, %c0_0] : memref<256x256xbf16, #tpu.memory_space<vmem>>, vector<256x256xbf16>
    %c0_1 = arith.constant 0 : index
    %c0_2 = arith.constant 0 : index
    %1 = vector.load %arg3[%c0_1, %c0_2] : memref<256x128xbf16, #tpu.memory_space<vmem>>, vector<256x128xbf16>
    %cst = arith.constant dense<0.000000e+00> : vector<256x128xf32>
    %2 = tpu.matmul %0, %1, %cst {dimension_numbers = #tpu.dot_dimension_numbers<[1], [0], [0], [1], [0, 0, 1, 1], [], []>} : vector<256x256xbf16>, vector<256x128xbf16>, vector<256x128xf32> -> vector<256x128xf32>
    %c0_3 = arith.constant 0 : index
    %c0_4 = arith.constant 0 : index
    %3 = vector.load %arg4[%c0_3, %c0_4] : memref<1x128xf32, #tpu.memory_space<vmem>>, vector<1x128xf32>
    %4 = vector.broadcast %3 : vector<1x128xf32> to vector<256x128xf32>
    %5 = arith.addf %2, %4 : vector<256x128xf32>
    %c0_5 = arith.constant 0 : index
    %c0_6 = arith.constant 0 : index
    %6 = vector.load %arg5[%c0_5, %c0_6] : memref<256x128xf32, #tpu.memory_space<vmem>>, vector<256x128xf32>
    tpu.vector_store %arg5[%c0_5, %c0_6], %5 {strides = array<i32>} : memref<256x128xf32, #tpu.memory_space<vmem>>, vector<256x128xf32>,
    return
  }
  func.func @transform_0(%arg0: i32, %arg1: i32) -> (i32, i32) {
    %c0_i32 = arith.constant 0 : i32
    %c0_i32_0 = arith.constant 0 : i32
    return %arg0, %c0_i32 : i32, i32
  }
  func.func @transform_1(%arg0: i32, %arg1: i32) -> (i32, i32) {
    %c0_i32 = arith.constant 0 : i32
    %c0_i32_0 = arith.constant 0 : i32
    return %c0_i32, %arg1 : i32, i32
  }
  func.func @transform_2(%arg0: i32, %arg1: i32) -> (i32, i32) {
    %c0_i32 = arith.constant 0 : i32
    %c0_i32_0 = arith.constant 0 : i32
    return %c0_i32, %arg1 : i32, i32
  }
  func.func @transform_3(%arg0: i32, %arg1: i32) -> (i32, i32) {
    %c0_i32 = arith.constant 0 : i32
    return %arg0, %arg1 : i32, i32
  }
}

module attributes {stable_mosaic.version = 11 : i64} {
  func.func @_max9_kernel(%arg0: i32, %arg1: memref<128x64xf32, #tpu.memory_space<vmem>>, %arg2: memref<128x64xf32, #tpu.memory_space<vmem>>, %arg3: memref<128x64xf32, #tpu.memory_space<vmem>>, %arg4: memref<128x64xf32, #tpu.memory_space<vmem>>, %arg5: memref<128x64xf32, #tpu.memory_space<vmem>>, %arg6: memref<128x64xf32, #tpu.memory_space<vmem>>, %arg7: memref<128x64xf32, #tpu.memory_space<vmem>>, %arg8: memref<128x64xf32, #tpu.memory_space<vmem>>, %arg9: memref<128x64xf32, #tpu.memory_space<vmem>>, %arg10: memref<128x64xf32, #tpu.memory_space<vmem>>) attributes {dimension_semantics = [#tpu.dimension_semantics<arbitrary>], iteration_bounds = array<i64: 1>, scalar_prefetch = 0 : i64, scratch_operands = 0 : i64, tpu.core_type = #tpu.core_type<tc>, window_params = [{pipeline_mode = #tpu.pipeline_mode<synchronous>, transform_indices = @transform_0, window_bounds = array<i64: 128, 64>}, {pipeline_mode = #tpu.pipeline_mode<synchronous>, transform_indices = @transform_1, window_bounds = array<i64: 128, 64>}, {pipeline_mode = #tpu.pipeline_mode<synchronous>, transform_indices = @transform_2, window_bounds = array<i64: 128, 64>}, {pipeline_mode = #tpu.pipeline_mode<synchronous>, transform_indices = @transform_3, window_bounds = array<i64: 128, 64>}, {pipeline_mode = #tpu.pipeline_mode<synchronous>, transform_indices = @transform_4, window_bounds = array<i64: 128, 64>}, {pipeline_mode = #tpu.pipeline_mode<synchronous>, transform_indices = @transform_5, window_bounds = array<i64: 128, 64>}, {pipeline_mode = #tpu.pipeline_mode<synchronous>, transform_indices = @transform_6, window_bounds = array<i64: 128, 64>}, {pipeline_mode = #tpu.pipeline_mode<synchronous>, transform_indices = @transform_7, window_bounds = array<i64: 128, 64>}, {pipeline_mode = #tpu.pipeline_mode<synchronous>, transform_indices = @transform_8, window_bounds = array<i64: 128, 64>}, {pipeline_mode = #tpu.pipeline_mode<synchronous>, transform_indices = @transform_9, window_bounds = array<i64: 128, 64>}]} {
    %c0 = arith.constant 0 : index
    %c0_0 = arith.constant 0 : index
    %0 = vector.load %arg1[%c0, %c0_0] : memref<128x64xf32, #tpu.memory_space<vmem>>, vector<128x64xf32>
    %c0_1 = arith.constant 0 : index
    %c0_2 = arith.constant 0 : index
    %1 = vector.load %arg2[%c0_1, %c0_2] : memref<128x64xf32, #tpu.memory_space<vmem>>, vector<128x64xf32>
    %2 = arith.maximumf %0, %1 : vector<128x64xf32>
    %c0_3 = arith.constant 0 : index
    %c0_4 = arith.constant 0 : index
    %3 = vector.load %arg3[%c0_3, %c0_4] : memref<128x64xf32, #tpu.memory_space<vmem>>, vector<128x64xf32>
    %4 = arith.maximumf %2, %3 : vector<128x64xf32>
    %c0_5 = arith.constant 0 : index
    %c0_6 = arith.constant 0 : index
    %5 = vector.load %arg4[%c0_5, %c0_6] : memref<128x64xf32, #tpu.memory_space<vmem>>, vector<128x64xf32>
    %6 = arith.maximumf %4, %5 : vector<128x64xf32>
    %c0_7 = arith.constant 0 : index
    %c0_8 = arith.constant 0 : index
    %7 = vector.load %arg5[%c0_7, %c0_8] : memref<128x64xf32, #tpu.memory_space<vmem>>, vector<128x64xf32>
    %8 = arith.maximumf %6, %7 : vector<128x64xf32>
    %c0_9 = arith.constant 0 : index
    %c0_10 = arith.constant 0 : index
    %9 = vector.load %arg6[%c0_9, %c0_10] : memref<128x64xf32, #tpu.memory_space<vmem>>, vector<128x64xf32>
    %10 = arith.maximumf %8, %9 : vector<128x64xf32>
    %c0_11 = arith.constant 0 : index
    %c0_12 = arith.constant 0 : index
    %11 = vector.load %arg7[%c0_11, %c0_12] : memref<128x64xf32, #tpu.memory_space<vmem>>, vector<128x64xf32>
    %12 = arith.maximumf %10, %11 : vector<128x64xf32>
    %c0_13 = arith.constant 0 : index
    %c0_14 = arith.constant 0 : index
    %13 = vector.load %arg8[%c0_13, %c0_14] : memref<128x64xf32, #tpu.memory_space<vmem>>, vector<128x64xf32>
    %14 = arith.maximumf %12, %13 : vector<128x64xf32>
    %c0_15 = arith.constant 0 : index
    %c0_16 = arith.constant 0 : index
    %15 = vector.load %arg9[%c0_15, %c0_16] : memref<128x64xf32, #tpu.memory_space<vmem>>, vector<128x64xf32>
    %16 = arith.maximumf %14, %15 : vector<128x64xf32>
    %c0_17 = arith.constant 0 : index
    %c0_18 = arith.constant 0 : index
    %17 = vector.load %arg10[%c0_17, %c0_18] : memref<128x64xf32, #tpu.memory_space<vmem>>, vector<128x64xf32>
    tpu.vector_store %arg10[%c0_17, %c0_18], %16 {strides = array<i32>} : memref<128x64xf32, #tpu.memory_space<vmem>>, vector<128x64xf32>,
    return
  }
  func.func @transform_0(%arg0: i32) -> (i32, i32) {
    %c0_i32 = arith.constant 0 : i32
    %c0_i32_0 = arith.constant 0 : i32
    %c0_i32_1 = arith.constant 0 : i32
    return %c0_i32, %c0_i32_0 : i32, i32
  }
  func.func @transform_1(%arg0: i32) -> (i32, i32) {
    %c0_i32 = arith.constant 0 : i32
    %c0_i32_0 = arith.constant 0 : i32
    %c0_i32_1 = arith.constant 0 : i32
    return %c0_i32, %c0_i32_0 : i32, i32
  }
  func.func @transform_2(%arg0: i32) -> (i32, i32) {
    %c0_i32 = arith.constant 0 : i32
    %c0_i32_0 = arith.constant 0 : i32
    %c0_i32_1 = arith.constant 0 : i32
    return %c0_i32, %c0_i32_0 : i32, i32
  }
  func.func @transform_3(%arg0: i32) -> (i32, i32) {
    %c0_i32 = arith.constant 0 : i32
    %c0_i32_0 = arith.constant 0 : i32
    %c0_i32_1 = arith.constant 0 : i32
    return %c0_i32, %c0_i32_0 : i32, i32
  }
  func.func @transform_4(%arg0: i32) -> (i32, i32) {
    %c0_i32 = arith.constant 0 : i32
    %c0_i32_0 = arith.constant 0 : i32
    %c0_i32_1 = arith.constant 0 : i32
    return %c0_i32, %c0_i32_0 : i32, i32
  }
  func.func @transform_5(%arg0: i32) -> (i32, i32) {
    %c0_i32 = arith.constant 0 : i32
    %c0_i32_0 = arith.constant 0 : i32
    %c0_i32_1 = arith.constant 0 : i32
    return %c0_i32, %c0_i32_0 : i32, i32
  }
  func.func @transform_6(%arg0: i32) -> (i32, i32) {
    %c0_i32 = arith.constant 0 : i32
    %c0_i32_0 = arith.constant 0 : i32
    %c0_i32_1 = arith.constant 0 : i32
    return %c0_i32, %c0_i32_0 : i32, i32
  }
  func.func @transform_7(%arg0: i32) -> (i32, i32) {
    %c0_i32 = arith.constant 0 : i32
    %c0_i32_0 = arith.constant 0 : i32
    %c0_i32_1 = arith.constant 0 : i32
    return %c0_i32, %c0_i32_0 : i32, i32
  }
  func.func @transform_8(%arg0: i32) -> (i32, i32) {
    %c0_i32 = arith.constant 0 : i32
    %c0_i32_0 = arith.constant 0 : i32
    %c0_i32_1 = arith.constant 0 : i32
    return %c0_i32, %c0_i32_0 : i32, i32
  }
  func.func @transform_9(%arg0: i32) -> (i32, i32) {
    %c0_i32 = arith.constant 0 : i32
    %c0_i32_0 = arith.constant 0 : i32
    %c0_i32_1 = arith.constant 0 : i32
    return %c0_i32, %c0_i32_0 : i32, i32
  }
}

</mosaic_0001>

<bundles_post_ra>
// kernel: stem_forward.3
= control target key start
LH: loop header
LB: loop body
LE: loop exit
PB: predicated region body
PF: predicated region fallthrough
CT: control target
= control target key end

     0   :  { %s1175_s12 = smov 0   ;;  %s1177_s13 = smov 0   ;;  %s1368_s0 = inlined_call_operand.vmem [shape: bf16[512,256], index: 0, kind: input, shape index: {}]   ;;  %s1369_s1 = inlined_call_operand.vmem [shape: bf16[256,128], index: 1, kind: input, shape index: {}]   ;;  %s1370_s2 = inlined_call_operand.vmem [shape: f32[1,128], index: 2, kind: input, shape index: {}]   ;;  %s1371_s3 = inlined_call_operand.vmem [shape: f32[512,128], index: 3, kind: output, shape index: {}]  }
   0x1   :  { %s1179_s14 = smov 0  }
   0x2 LB: > { %s25_s15 = sadd.s32 1, %s1149_s13  ;;  %p857_p0 = scmp.ge.s32.totalorder %s1153_s14, 1  ;;  %s1153_s14 = sphi %s1179_s14, %s13_s14   ;;  %s1149_s13 = sphi %s1177_s13, %s1373_s13   ;;  %s1145_s12 = sphi %s1175_s12, %s1372_s12  }
   0x3   : > { %p27_p1 = scmp.ge.s32.totalorder %s25_s15, 2  ;;  %p170_p2 = scmp.lt.s32.totalorder %s1153_s14, 3 }
   0x5   : > { %s1375_s15 = smov (%p27_p1, %s25_s15), 0  ;;  %p171_p3 = pnand %p857_p0, %p170_p2 }
   0x6   : > { %s858_s18 = sshll.u32 (!%p171_p3), %s1145_s12, 5 }
   0x7   : > { %174 = sbr.rel (%p171_p3) target bundleno = 305 (0x131), region = 32  ;;  %p206_p4 = scmp.lt.s32.totalorder (!%p171_p3), %s858_s18, 63 }
   0xc   : > { %v1067_v0 = vld [vmem:[%s1369_s1 + $0x78] sm:$0xff]   ;;  %v1069_v2 = vld [vmem:[%s1369_s1 + $0x70] sm:$0xff]   ;;  %v1071_v4 = vld [vmem:[%s1369_s1 + $0x68] sm:$0xff]   ;;  %s1377_s18 = smov (!%p206_p4, %s858_s18), 63 }
   0xd   : > { %v1068_v1 = vld [vmem:[%s1369_s1 + $0x38] sm:$0xff]   ;;  %915 = vmatprep.subr.bf16.mxu0 %v1067_v0  ;;  %1027 = vmatprep.subr.bf16.mxu1 %v1067_v0  ;;  %v1070_v3 = vld [vmem:[%s1369_s1 + $0x30] sm:$0xff]   ;;  %v1072_v5 = vld [vmem:[%s1369_s1 + $0x28] sm:$0xff]   ;;  %s914_s6 = sshll.u32 %s1377_s18, 3 }
   0xe   : > { %916 = vmatpush3.bf16.msra.mxu0 %v1068_v1  ;;  %1035 = vmatpush3.bf16.msra.mxu1 %v1068_v1  ;;  %v1073_v6 = vld [vmem:[%s1369_s1 + $0x60] sm:$0xff]   ;;  %v1075_v8 = vld [vmem:[%s1369_s1 + $0x58] sm:$0xff]   ;;  %s1228_s11 = scalar_lea.vmem %s1368_s0, %s914_s6  ;;  %v1077_v10 = vld [vmem:[%s1369_s1 + $0x50] sm:$0xff]   ;;  %s1293_s8 = scalar_lea.vmem %s1371_s3, %s914_s6 }
   0xf   : > { %917 = vmatprep.subr.bf16.mxu0 %v1069_v2  ;;  %1028 = vmatprep.subr.bf16.mxu1 %v1069_v2  ;;  %v1074_v7 = vld [vmem:[%s1369_s1 + $0x20] sm:$0xff]   ;;  %v1076_v9 = vld [vmem:[%s1369_s1 + $0x18] sm:$0xff]   ;;  %v1078_v13 = vld [vmem:[%s1369_s1 + $0x10] sm:$0xff]  }
  0x10   : > { %v1085_v11 = vld [vmem:[%s1228_s11 + $0x4] ss:$8 sps:$4 sm:$0xff]   ;;  %v1083_v18 = vld [vmem:[%s1228_s11] ss:$8 sps:$4 sm:$0xff]   ;;  %v1089_v20 = vld [vmem:[%s1228_s11 + $0x14] ss:$8 sps:$4 sm:$0xff]  }
  0x11   : > { %v1088_v12 = vld [vmem:[%s1228_s11 + $0x84] ss:$8 sps:$4 sm:$0xff]   ;;  %588 = vmatprep.mubr.bf16.mxu0 %v1085_v11  ;;  %v1086_v19 = vld [vmem:[%s1228_s11 + $0x80] ss:$8 sps:$4 sm:$0xff]   ;;  %v1091_v21 = vld [vmem:[%s1228_s11 + $0x94] ss:$8 sps:$4 sm:$0xff]  }
  0x12   : > { %918 = vmatpush3.bf16.msra.mxu0 %v1070_v3  ;;  %1036 = vmatpush3.bf16.msra.mxu1 %v1070_v3  ;;  %v1079_v14 = vld [vmem:[%s1369_s1 + $0x48] sm:$0xff]   ;;  %v1081_v16 = vld [vmem:[%s1369_s1 + $0x40] sm:$0xff]   ;;  %v1093_v22 = vld [vmem:[%s1228_s11 + $0x10] ss:$8 sps:$4 sm:$0xff]  }
  0x13   : > { %919 = vmatprep.subr.bf16.mxu0 %v1071_v4  ;;  %1029 = vmatprep.subr.bf16.mxu1 %v1071_v4  ;;  %v1080_v15 = vld [vmem:[%s1369_s1 + $0x8] sm:$0xff]   ;;  %v1082_v17 = vld [vmem:[%s1369_s1] sm:$0xff]   ;;  %v1094_v23 = vld [vmem:[%s1228_s11 + $0x90] ss:$8 sps:$4 sm:$0xff]  }
  0x14   : > { %652 = vmatprep.mubr.bf16.mxu1 %v1088_v12  ;;  %v1095_v24 = vld [vmem:[%s1228_s11 + $0x24] ss:$8 sps:$4 sm:$0xff]   ;;  %v1099_v26 = vld [vmem:[%s1228_s11 + $0x20] ss:$8 sps:$4 sm:$0xff]   ;;  %v1101_v28 = vld [vmem:[%s1228_s11 + $0x34] ss:$8 sps:$4 sm:$0xff]  }
  0x15   : > { %v1097_v25 = vld [vmem:[%s1228_s11 + $0xa4] ss:$8 sps:$4 sm:$0xff]   ;;  %v1100_v27 = vld [vmem:[%s1228_s11 + $0xa0] ss:$8 sps:$4 sm:$0xff]   ;;  %v1103_v29 = vld [vmem:[%s1228_s11 + $0xb4] ss:$8 sps:$4 sm:$0xff]  }
  0x16   : > { %920 = vmatpush3.bf16.msra.mxu0 %v1072_v5  ;;  %1037 = vmatpush3.bf16.msra.mxu1 %v1072_v5  ;;  %v1105_v30 = vld [vmem:[%s1228_s11 + $0x30] ss:$8 sps:$4 sm:$0xff]   ;;  %v1107_v32 = vld [vmem:[%s1228_s11 + $0x44] ss:$8 sps:$4 sm:$0xff]   ;;  %v1111_v34 = vld [vmem:[%s1228_s11 + $0x40] ss:$8 sps:$4 sm:$0xff]  }
  0x17   : > { %921 = vmatprep.subr.bf16.mxu0 %v1073_v6  ;;  %1030 = vmatprep.subr.bf16.mxu1 %v1073_v6  ;;  %v1106_v31 = vld [vmem:[%s1228_s11 + $0xb0] ss:$8 sps:$4 sm:$0xff]   ;;  %v1109_v33 = vld [vmem:[%s1228_s11 + $0xc4] ss:$8 sps:$4 sm:$0xff]   ;;  %v1112_v35 = vld [vmem:[%s1228_s11 + $0xc0] ss:$8 sps:$4 sm:$0xff]  }
  0x18   : > { %v1113_v36 = vld [vmem:[%s1228_s11 + $0x54] ss:$8 sps:$4 sm:$0xff]   ;;  %v1117_v38 = vld [vmem:[%s1228_s11 + $0x50] ss:$8 sps:$4 sm:$0xff]   ;;  %v1119_v40 = vld [vmem:[%s1228_s11 + $0x64] ss:$8 sps:$4 sm:$0xff]  }
  0x19   : > { %v1115_v37 = vld [vmem:[%s1228_s11 + $0xd4] ss:$8 sps:$4 sm:$0xff]   ;;  %v1118_v39 = vld [vmem:[%s1228_s11 + $0xd0] ss:$8 sps:$4 sm:$0xff]   ;;  %v1121_v41 = vld [vmem:[%s1228_s11 + $0xe4] ss:$8 sps:$4 sm:$0xff]  }
  0x1a   : > { %922 = vmatpush3.bf16.msra.mxu0 %v1074_v7  ;;  %1038 = vmatpush3.bf16.msra.mxu1 %v1074_v7  ;;  %v1123_v42 = vld [vmem:[%s1228_s11 + $0x60] ss:$8 sps:$4 sm:$0xff]   ;;  %v1125_v44 = vld [vmem:[%s1228_s11 + $0x74] ss:$8 sps:$4 sm:$0xff]   ;;  %v1129_v46 = vld [vmem:[%s1228_s11 + $0x70] ss:$8 sps:$4 sm:$0xff]  }
  0x1b   : > { %923 = vmatprep.subr.bf16.mxu0 %v1075_v8  ;;  %1031 = vmatprep.subr.bf16.mxu1 %v1075_v8  ;;  %v1124_v43 = vld [vmem:[%s1228_s11 + $0xe0] ss:$8 sps:$4 sm:$0xff]   ;;  %v1127_v45 = vld [vmem:[%s1228_s11 + $0xf4] ss:$8 sps:$4 sm:$0xff]   ;;  %v1130_v47 = vld [vmem:[%s1228_s11 + $0xf0] ss:$8 sps:$4 sm:$0xff]  }
  0x1c   : > { %v1286_v50 = vld [vmem:[%s1370_s2] ss:$0 sm:$0xff] }
  0x1e   : > { %924 = vmatpush3.bf16.msra.mxu0 %v1076_v9  ;;  %1039 = vmatpush3.bf16.msra.mxu1 %v1076_v9 }
  0x1f   : > { %925 = vmatprep.subr.bf16.mxu0 %v1077_v10  ;;  %1032 = vmatprep.subr.bf16.mxu1 %v1077_v10 }
  0x22   : > { %926 = vmatpush3.bf16.msra.mxu0 %v1078_v13  ;;  %1040 = vmatpush3.bf16.msra.mxu1 %v1078_v13 }
  0x23   : > { %927 = vmatprep.subr.bf16.mxu0 %v1079_v14  ;;  %1033 = vmatprep.subr.bf16.mxu1 %v1079_v14 }
  0x26   : > { %928 = vmatpush3.bf16.msra.mxu0 %v1080_v15  ;;  %1041 = vmatpush3.bf16.msra.mxu1 %v1080_v15 }
  0x27   : > { %929 = vmatprep.subr.bf16.mxu0 %v1081_v16  ;;  %1034 = vmatprep.subr.bf16.mxu1 %v1081_v16 }
  0x2a   : > { %930 = vmatpush3.bf16.msra.mxu0 %v1082_v17  ;;  %1042 = vmatpush3.bf16.msra.mxu1 %v1082_v17 }
  0x2d   : > { %589 = vmatmul.mubr.bf16.vlgmr.msra.gmra.mxu0 %v1083_v18  ;;  %653 = vmatmul.mubr.bf16.vlgmr.msra.gmra.mxu1 %v1086_v19 }
  0x2e   : > { %596 = vmatprep.mubr.bf16.mxu0 %v1089_v20  ;;  %660 = vmatprep.mubr.bf16.mxu1 %v1091_v21 }
  0x35   : > { %597 = vmatmul.mubr.bf16.gmra.mxu0 %v1093_v22  ;;  %661 = vmatmul.mubr.bf16.gmra.mxu1 %v1094_v23 }
  0x36   : > { %604 = vmatprep.mubr.bf16.mxu0 %v1095_v24  ;;  %668 = vmatprep.mubr.bf16.mxu1 %v1097_v25 }
  0x3d   : > { %605 = vmatmul.mubr.bf16.gmra.mxu0 %v1099_v26  ;;  %669 = vmatmul.mubr.bf16.gmra.mxu1 %v1100_v27 }
  0x3e   : > { %612 = vmatprep.mubr.bf16.mxu0 %v1101_v28  ;;  %676 = vmatprep.mubr.bf16.mxu1 %v1103_v29 }
  0x45   : > { %613 = vmatmul.mubr.bf16.gmra.mxu0 %v1105_v30  ;;  %677 = vmatmul.mubr.bf16.gmra.mxu1 %v1106_v31 }
  0x46   : > { %620 = vmatprep.mubr.bf16.mxu0 %v1107_v32  ;;  %684 = vmatprep.mubr.bf16.mxu1 %v1109_v33 }
  0x4d   : > { %621 = vmatmul.mubr.bf16.gmra.mxu0 %v1111_v34  ;;  %685 = vmatmul.mubr.bf16.gmra.mxu1 %v1112_v35 }
  0x4e   : > { %628 = vmatprep.mubr.bf16.mxu0 %v1113_v36  ;;  %692 = vmatprep.mubr.bf16.mxu1 %v1115_v37 }
  0x55   : > { %629 = vmatmul.mubr.bf16.gmra.mxu0 %v1117_v38  ;;  %693 = vmatmul.mubr.bf16.gmra.mxu1 %v1118_v39 }
  0x56   : > { %636 = vmatprep.mubr.bf16.mxu0 %v1119_v40  ;;  %700 = vmatprep.mubr.bf16.mxu1 %v1121_v41 }
  0x5d   : > { %637 = vmatmul.mubr.bf16.gmra.mxu0 %v1123_v42  ;;  %701 = vmatmul.mubr.bf16.gmra.mxu1 %v1124_v43 }
  0x5e   : > { %644 = vmatprep.mubr.bf16.mxu0 %v1125_v44  ;;  %708 = vmatprep.mubr.bf16.mxu1 %v1127_v45 }
  0x65   : > { %645 = vmatmul.mubr.bf16.gmra.mxu0 %v1129_v46  ;;  %709 = vmatmul.mubr.bf16.gmra.mxu1 %v1130_v47 }
  0xed   : > { %v931_v48 = vpop.f32.mrf.mxu0  ;;  %v979_v49 = vpop.f32.mrf.mxu1 }
  0xef   : > { %v932_v51 = vpop.f32.mrf.mxu0  ;;  %v980_v52 = vpop.f32.mrf.mxu1 }
  0xf0   : > { %v933_v53 = vadd.f32 %v932_v51, %v931_v48  ;;  %v981_v54 = vadd.f32 %v980_v52, %v979_v49 }
  0xf1   : > { %v934_v55 = vpop.f32.mrf.mxu0  ;;  %v982_v56 = vpop.f32.mrf.mxu1 }
  0xf2   : > { %v591_v57 = vadd.f32 %v933_v53, %v1286_v50  ;;  %v655_v58 = vadd.f32 %v981_v54, %v1286_v50 }
  0xf3   : > { %v935_v59 = vpop.f32.mrf.mxu0  ;;  %v983_v60 = vpop.f32.mrf.mxu1 }
  0xf4   : > { %717 = vst [vmem:[%s1293_s8] sm:$0xff] %v591_v57  ;;  %733 = vst [vmem:[%s1293_s8 + $0x80] sm:$0xff] %v655_v58  ;;  %v936_v61 = vadd.f32 %v935_v59, %v934_v55  ;;  %v984_v62 = vadd.f32 %v983_v60, %v982_v56 }
  0xf5   : > { %v937_v63 = vpop.f32.mrf.mxu0  ;;  %v985_v0 = vpop.f32.mrf.mxu1 }
  0xf6   : > { %v594_v1 = vadd.f32 %v936_v61, %v1286_v50  ;;  %v658_v2 = vadd.f32 %v984_v62, %v1286_v50 }
  0xf7   : > { %v938_v3 = vpop.f32.mrf.mxu0  ;;  %v986_v4 = vpop.f32.mrf.mxu1 }
  0xf8   : > { %718 = vst [vmem:[%s1293_s8 + $0x8] sm:$0xff] %v594_v1  ;;  %734 = vst [vmem:[%s1293_s8 + $0x88] sm:$0xff] %v658_v2  ;;  %v939_v5 = vadd.f32 %v938_v3, %v937_v63  ;;  %v987_v6 = vadd.f32 %v986_v4, %v985_v0 }
  0xf9   : > { %v940_v7 = vpop.f32.mrf.mxu0  ;;  %v988_v8 = vpop.f32.mrf.mxu1 }
  0xfa   : > { %v599_v9 = vadd.f32 %v939_v5, %v1286_v50  ;;  %v663_v10 = vadd.f32 %v987_v6, %v1286_v50 }
  0xfb   : > { %v941_v11 = vpop.f32.mrf.mxu0  ;;  %v989_v12 = vpop.f32.mrf.mxu1 }
  0xfc   : > { %719 = vst [vmem:[%s1293_s8 + $0x10] sm:$0xff] %v599_v9  ;;  %735 = vst [vmem:[%s1293_s8 + $0x90] sm:$0xff] %v663_v10  ;;  %v942_v13 = vadd.f32 %v941_v11, %v940_v7  ;;  %v990_v14 = vadd.f32 %v989_v12, %v988_v8 }
  0xfd   : > { %v943_v15 = vpop.f32.mrf.mxu0  ;;  %v991_v16 = vpop.f32.mrf.mxu1 }
  0xfe   : > { %v602_v17 = vadd.f32 %v942_v13, %v1286_v50  ;;  %v666_v18 = vadd.f32 %v990_v14, %v1286_v50 }
  0xff   : > { %v944_v19 = vpop.f32.mrf.mxu0  ;;  %v992_v20 = vpop.f32.mrf.mxu1 }
 0x100   : > { %720 = vst [vmem:[%s1293_s8 + $0x18] sm:$0xff] %v602_v17  ;;  %736 = vst [vmem:[%s1293_s8 + $0x98] sm:$0xff] %v666_v18  ;;  %v945_v21 = vadd.f32 %v944_v19, %v943_v15  ;;  %v993_v22 = vadd.f32 %v992_v20, %v991_v16 }
 0x101   : > { %v946_v23 = vpop.f32.mrf.mxu0  ;;  %v994_v24 = vpop.f32.mrf.mxu1 }
 0x102   : > { %v607_v25 = vadd.f32 %v945_v21, %v1286_v50  ;;  %v671_v26 = vadd.f32 %v993_v22, %v1286_v50 }
 0x103   : > { %v947_v27 = vpop.f32.mrf.mxu0  ;;  %v995_v28 = vpop.f32.mrf.mxu1 }
 0x104   : > { %721 = vst [vmem:[%s1293_s8 + $0x20] sm:$0xff] %v607_v25  ;;  %737 = vst [vmem:[%s1293_s8 + $0xa0] sm:$0xff] %v671_v26  ;;  %v948_v29 = vadd.f32 %v947_v27, %v946_v23  ;;  %v996_v30 = vadd.f32 %v995_v28, %v994_v24 }
 0x105   : > { %v949_v31 = vpop.f32.mrf.mxu0  ;;  %v997_v32 = vpop.f32.mrf.mxu1 }
 0x106   : > { %v610_v33 = vadd.f32 %v948_v29, %v1286_v50  ;;  %v674_v34 = vadd.f32 %v996_v30, %v1286_v50 }
 0x107   : > { %v950_v35 = vpop.f32.mrf.mxu0  ;;  %v998_v36 = vpop.f32.mrf.mxu1 }
 0x108   : > { %722 = vst [vmem:[%s1293_s8 + $0x28] sm:$0xff] %v610_v33  ;;  %738 = vst [vmem:[%s1293_s8 + $0xa8] sm:$0xff] %v674_v34  ;;  %v951_v37 = vadd.f32 %v950_v35, %v949_v31  ;;  %v999_v38 = vadd.f32 %v998_v36, %v997_v32 }
 0x109   : > { %v952_v39 = vpop.f32.mrf.mxu0  ;;  %v1000_v40 = vpop.f32.mrf.mxu1 }
 0x10a   : > { %v615_v41 = vadd.f32 %v951_v37, %v1286_v50  ;;  %v679_v42 = vadd.f32 %v999_v38, %v1286_v50 }
 0x10b   : > { %v953_v43 = vpop.f32.mrf.mxu0  ;;  %v1001_v44 = vpop.f32.mrf.mxu1 }
 0x10c   : > { %723 = vst [vmem:[%s1293_s8 + $0x30] sm:$0xff] %v615_v41  ;;  %739 = vst [vmem:[%s1293_s8 + $0xb0] sm:$0xff] %v679_v42  ;;  %v954_v45 = vadd.f32 %v953_v43, %v952_v39  ;;  %v1002_v46 = vadd.f32 %v1001_v44, %v1000_v40 }
 0x10d   : > { %v955_v47 = vpop.f32.mrf.mxu0  ;;  %v1003_v48 = vpop.f32.mrf.mxu1 }
 0x10e   : > { %v618_v49 = vadd.f32 %v954_v45, %v1286_v50  ;;  %v682_v51 = vadd.f32 %v1002_v46, %v1286_v50 }
 0x10f   : > { %v956_v52 = vpop.f32.mrf.mxu0  ;;  %v1004_v53 = vpop.f32.mrf.mxu1 }
 0x110   : > { %724 = vst [vmem:[%s1293_s8 + $0x38] sm:$0xff] %v618_v49  ;;  %740 = vst [vmem:[%s1293_s8 + $0xb8] sm:$0xff] %v682_v51  ;;  %v957_v54 = vadd.f32 %v956_v52, %v955_v47  ;;  %v1005_v55 = vadd.f32 %v1004_v53, %v1003_v48 }
 0x111   : > { %v958_v56 = vpop.f32.mrf.mxu0  ;;  %v1006_v57 = vpop.f32.mrf.mxu1 }
 0x112   : > { %v623_v58 = vadd.f32 %v957_v54, %v1286_v50  ;;  %v687_v59 = vadd.f32 %v1005_v55, %v1286_v50 }
 0x113   : > { %v959_v60 = vpop.f32.mrf.mxu0  ;;  %v1007_v61 = vpop.f32.mrf.mxu1 }
 0x114   : > { %725 = vst [vmem:[%s1293_s8 + $0x40] sm:$0xff] %v623_v58  ;;  %741 = vst [vmem:[%s1293_s8 + $0xc0] sm:$0xff] %v687_v59  ;;  %v960_v62 = vadd.f32 %v959_v60, %v958_v56  ;;  %v1008_v63 = vadd.f32 %v1007_v61, %v1006_v57 }
 0x115   : > { %v961_v0 = vpop.f32.mrf.mxu0  ;;  %v1009_v1 = vpop.f32.mrf.mxu1 }
 0x116   : > { %v626_v2 = vadd.f32 %v960_v62, %v1286_v50  ;;  %v690_v3 = vadd.f32 %v1008_v63, %v1286_v50 }
 0x117   : > { %v962_v4 = vpop.f32.mrf.mxu0  ;;  %v1010_v5 = vpop.f32.mrf.mxu1 }
 0x118   : > { %726 = vst [vmem:[%s1293_s8 + $0x48] sm:$0xff] %v626_v2  ;;  %742 = vst [vmem:[%s1293_s8 + $0xc8] sm:$0xff] %v690_v3  ;;  %v963_v6 = vadd.f32 %v962_v4, %v961_v0  ;;  %v1011_v7 = vadd.f32 %v1010_v5, %v1009_v1 }
 0x119   : > { %v964_v8 = vpop.f32.mrf.mxu0  ;;  %v1012_v9 = vpop.f32.mrf.mxu1 }
 0x11a   : > { %v631_v10 = vadd.f32 %v963_v6, %v1286_v50  ;;  %v695_v11 = vadd.f32 %v1011_v7, %v1286_v50 }
 0x11b   : > { %v965_v12 = vpop.f32.mrf.mxu0  ;;  %v1013_v13 = vpop.f32.mrf.mxu1 }
 0x11c   : > { %727 = vst [vmem:[%s1293_s8 + $0x50] sm:$0xff] %v631_v10  ;;  %743 = vst [vmem:[%s1293_s8 + $0xd0] sm:$0xff] %v695_v11  ;;  %v966_v14 = vadd.f32 %v965_v12, %v964_v8  ;;  %v1014_v15 = vadd.f32 %v1013_v13, %v1012_v9 }
 0x11d   : > { %v967_v16 = vpop.f32.mrf.mxu0  ;;  %v1015_v17 = vpop.f32.mrf.mxu1 }
 0x11e   : > { %v634_v18 = vadd.f32 %v966_v14, %v1286_v50  ;;  %v698_v19 = vadd.f32 %v1014_v15, %v1286_v50 }
 0x11f   : > { %v968_v20 = vpop.f32.mrf.mxu0  ;;  %v1016_v21 = vpop.f32.mrf.mxu1 }
 0x120   : > { %728 = vst [vmem:[%s1293_s8 + $0x58] sm:$0xff] %v634_v18  ;;  %744 = vst [vmem:[%s1293_s8 + $0xd8] sm:$0xff] %v698_v19  ;;  %v969_v22 = vadd.f32 %v968_v20, %v967_v16  ;;  %v1017_v23 = vadd.f32 %v1016_v21, %v1015_v17 }
 0x121   : > { %v970_v24 = vpop.f32.mrf.mxu0  ;;  %v1018_v25 = vpop.f32.mrf.mxu1 }
 0x122   : > { %v639_v26 = vadd.f32 %v969_v22, %v1286_v50  ;;  %v703_v27 = vadd.f32 %v1017_v23, %v1286_v50 }
 0x123   : > { %v971_v28 = vpop.f32.mrf.mxu0  ;;  %v1019_v29 = vpop.f32.mrf.mxu1 }
 0x124   : > { %729 = vst [vmem:[%s1293_s8 + $0x60] sm:$0xff] %v639_v26  ;;  %745 = vst [vmem:[%s1293_s8 + $0xe0] sm:$0xff] %v703_v27  ;;  %v972_v30 = vadd.f32 %v971_v28, %v970_v24  ;;  %v1020_v31 = vadd.f32 %v1019_v29, %v1018_v25 }
 0x125   : > { %v973_v32 = vpop.f32.mrf.mxu0  ;;  %v1021_v33 = vpop.f32.mrf.mxu1 }
 0x126   : > { %v642_v34 = vadd.f32 %v972_v30, %v1286_v50  ;;  %v706_v35 = vadd.f32 %v1020_v31, %v1286_v50 }
 0x127   : > { %v974_v36 = vpop.f32.mrf.mxu0  ;;  %v1022_v37 = vpop.f32.mrf.mxu1 }
 0x128   : > { %730 = vst [vmem:[%s1293_s8 + $0x68] sm:$0xff] %v642_v34  ;;  %746 = vst [vmem:[%s1293_s8 + $0xe8] sm:$0xff] %v706_v35  ;;  %v975_v38 = vadd.f32 %v974_v36, %v973_v32  ;;  %v1023_v39 = vadd.f32 %v1022_v37, %v1021_v33 }
 0x129   : > { %v976_v40 = vpop.f32.mrf.mxu0  ;;  %v1024_v41 = vpop.f32.mrf.mxu1 }
 0x12a   : > { %v647_v42 = vadd.f32 %v975_v38, %v1286_v50  ;;  %v711_v43 = vadd.f32 %v1023_v39, %v1286_v50 }
 0x12b   : > { %v977_v44 = vpop.f32.mrf.mxu0  ;;  %v1025_v45 = vpop.f32.mrf.mxu1 }
 0x12c   : > { %731 = vst [vmem:[%s1293_s8 + $0x70] sm:$0xff] %v647_v42  ;;  %747 = vst [vmem:[%s1293_s8 + $0xf0] sm:$0xff] %v711_v43  ;;  %v978_v46 = vadd.f32 %v977_v44, %v976_v40  ;;  %v1026_v47 = vadd.f32 %v1025_v45, %v1024_v41 }
 0x12e   : > { %v650_v48 = vadd.f32 %v978_v46, %v1286_v50  ;;  %v714_v49 = vadd.f32 %v1026_v47, %v1286_v50 }
 0x130   : > { %732 = vst [vmem:[%s1293_s8 + $0x78] sm:$0xff] %v650_v48  ;;  %748 = vst [vmem:[%s1293_s8 + $0xf8] sm:$0xff] %v714_v49 }
 0x131 PF: > { %s13_s14 = sadd.s32 1, %s1153_s14   ;;  %s1372_s12 = smov %s1149_s13 }
 0x132   : > { %p10_p5 = scmp.ge.s32.totalorder %s13_s14, 4   ;;  %s1373_s13 = smov %s1375_s15 }
 0x134   :  { %12 = sbr.rel (!%p10_p5) target bundleno = 2 (0x2), region = 68 }

// kernel: stem_forward.4
= control target key start
LH: loop header
LB: loop body
LE: loop exit
PB: predicated region body
PF: predicated region fallthrough
CT: control target
= control target key end

     0   :  { %vm80_vm0 = vcmask 523264   ;;  %s2262_s0 = inlined_call_operand.vmem [shape: f32[512,64], index: 0, kind: input, shape index: {}]   ;;  %s2263_s1 = inlined_call_operand.vmem [shape: f32[1,64], index: 1, kind: input, shape index: {}]   ;;  %s2264_s2 = inlined_call_operand.vmem [shape: f32[1,64], index: 2, kind: input, shape index: {}]   ;;  %s2265_s3 = inlined_call_operand.vmem [shape: f32[512,64], index: 3, kind: output, shape index: {}]  }
   0x1   :  { %v843_v0 = vld [vmem:[%s2262_s0] sm:$0xff]  ;;  %v848_v1 = vld [vmem:[%s2262_s0 + $0x8] sm:$0xff]  ;;  %v853_v2 = vld [vmem:[%s2262_s0 + $0x10] sm:$0xff] }
   0x2   :  { %v858_v3 = vld [vmem:[%s2262_s0 + $0x18] sm:$0xff]  ;;  %v81_v4 = vsel %vm80_vm0, %v843_v0, 0.0  ;;  %v82_v5 = vsel %vm80_vm0, %v848_v1, 0.0  ;;  %v84_v6 = vsel %vm80_vm0, %v853_v2, 0.0  ;;  %v869_v7 = vld [vmem:[%s2262_s0 + $0x20] sm:$0xff]  ;;  %v876_v10 = vld [vmem:[%s2262_s0 + $0x28] sm:$0xff] }
   0x3   :  { %v83_v8 = vadd.f32 %v82_v5, %v81_v4  ;;  %v86_v9 = vsel %vm80_vm0, %v858_v3, 0.0  ;;  %v88_v12 = vsel %vm80_vm0, %v869_v7, 0.0  ;;  %v883_v13 = vld [vmem:[%s2262_s0 + $0x30] sm:$0xff]  ;;  %v90_v15 = vsel %vm80_vm0, %v876_v10, 0.0  ;;  %v890_v16 = vld [vmem:[%s2262_s0 + $0x38] sm:$0xff]  ;;  %v897_v19 = vld [vmem:[%s2262_s0 + $0x40] sm:$0xff] }
   0x4   :  { %v92_v18 = vsel %vm80_vm0, %v883_v13, 0.0  ;;  %v94_v21 = vsel %vm80_vm0, %v890_v16, 0.0  ;;  %v904_v22 = vld [vmem:[%s2262_s0 + $0x48] sm:$0xff]  ;;  %v96_v24 = vsel %vm80_vm0, %v897_v19, 0.0  ;;  %v911_v25 = vld [vmem:[%s2262_s0 + $0x50] sm:$0xff]  ;;  %v918_v28 = vld [vmem:[%s2262_s0 + $0x58] sm:$0xff] }
   0x5   :  { %v85_v11 = vadd.f32 %v84_v6, %v83_v8  ;;  %v98_v27 = vsel %vm80_vm0, %v904_v22, 0.0  ;;  %v100_v30 = vsel %vm80_vm0, %v911_v25, 0.0  ;;  %v925_v31 = vld [vmem:[%s2262_s0 + $0x60] sm:$0xff]  ;;  %v102_v33 = vsel %vm80_vm0, %v918_v28, 0.0  ;;  %v932_v34 = vld [vmem:[%s2262_s0 + $0x68] sm:$0xff]  ;;  %v939_v37 = vld [vmem:[%s2262_s0 + $0x70] sm:$0xff] }
   0x6   :  { %v104_v36 = vsel %vm80_vm0, %v925_v31, 0.0  ;;  %v106_v39 = vsel %vm80_vm0, %v932_v34, 0.0  ;;  %v946_v40 = vld [vmem:[%s2262_s0 + $0x78] sm:$0xff]  ;;  %v108_v42 = vsel %vm80_vm0, %v939_v37, 0.0  ;;  %v953_v43 = vld [vmem:[%s2262_s0 + $0x80] sm:$0xff]  ;;  %v960_v46 = vld [vmem:[%s2262_s0 + $0x88] sm:$0xff] }
   0x7   :  { %v87_v14 = vadd.f32 %v86_v9, %v85_v11  ;;  %v110_v45 = vsel %vm80_vm0, %v946_v40, 0.0  ;;  %v112_v48 = vsel %vm80_vm0, %v953_v43, 0.0  ;;  %v967_v49 = vld [vmem:[%s2262_s0 + $0x90] sm:$0xff]  ;;  %v114_v51 = vsel %vm80_vm0, %v960_v46, 0.0  ;;  %v974_v52 = vld [vmem:[%s2262_s0 + $0x98] sm:$0xff]  ;;  %v981_v55 = vld [vmem:[%s2262_s0 + $0xa0] sm:$0xff] }
   0x8   :  { %v116_v54 = vsel %vm80_vm0, %v967_v49, 0.0  ;;  %v118_v57 = vsel %vm80_vm0, %v974_v52, 0.0  ;;  %v988_v58 = vld [vmem:[%s2262_s0 + $0xa8] sm:$0xff]  ;;  %v120_v60 = vsel %vm80_vm0, %v981_v55, 0.0  ;;  %v995_v61 = vld [vmem:[%s2262_s0 + $0xb0] sm:$0xff]  ;;  %v1002_v4 = vld [vmem:[%s2262_s0 + $0xb8] sm:$0xff] }
   0x9   :  { %v89_v17 = vadd.f32 %v88_v12, %v87_v14  ;;  %v122_v63 = vsel %vm80_vm0, %v988_v58, 0.0  ;;  %v124_v6 = vsel %vm80_vm0, %v995_v61, 0.0  ;;  %v1009_v8 = vld [vmem:[%s2262_s0 + $0xc0] sm:$0xff]  ;;  %v126_v11 = vsel %vm80_vm0, %v1002_v4, 0.0  ;;  %v1016_v12 = vld [vmem:[%s2262_s0 + $0xc8] sm:$0xff] }
   0xb   :  { %v91_v20 = vadd.f32 %v90_v15, %v89_v17  ;;  %v128_v15 = vsel %vm80_vm0, %v1009_v8, 0.0  ;;  %v1023_v17 = vld [vmem:[%s2262_s0 + $0xd0] sm:$0xff] }
   0xd   :  { %v93_v23 = vadd.f32 %v92_v18, %v91_v20  ;;  %v130_v20 = vsel %vm80_vm0, %v1016_v12, 0.0 }
   0xf   :  { %v95_v26 = vadd.f32 %v94_v21, %v93_v23  ;;  %v1030_v21 = vld [vmem:[%s2262_s0 + $0xd8] sm:$0xff] }
  0x11   :  { %v97_v29 = vadd.f32 %v96_v24, %v95_v26  ;;  %v132_v24 = vsel %vm80_vm0, %v1023_v17, 0.0  ;;  %v1037_v26 = vld [vmem:[%s2262_s0 + $0xe0] sm:$0xff] }
  0x13   :  { %v99_v32 = vadd.f32 %v98_v27, %v97_v29  ;;  %v134_v29 = vsel %vm80_vm0, %v1030_v21, 0.0 }
  0x15   :  { %v101_v35 = vadd.f32 %v100_v30, %v99_v32  ;;  %v1044_v30 = vld [vmem:[%s2262_s0 + $0xe8] sm:$0xff] }
  0x17   :  { %v103_v38 = vadd.f32 %v102_v33, %v101_v35  ;;  %v136_v33 = vsel %vm80_vm0, %v1037_v26, 0.0  ;;  %v1051_v35 = vld [vmem:[%s2262_s0 + $0xf0] sm:$0xff] }
  0x19   :  { %v105_v41 = vadd.f32 %v104_v36, %v103_v38  ;;  %v138_v38 = vsel %vm80_vm0, %v1044_v30, 0.0 }
  0x1b   :  { %v107_v44 = vadd.f32 %v106_v39, %v105_v41  ;;  %v1058_v39 = vld [vmem:[%s2262_s0 + $0xf8] sm:$0xff] }
  0x1d   :  { %v109_v47 = vadd.f32 %v108_v42, %v107_v44  ;;  %v140_v42 = vsel %vm80_vm0, %v1051_v35, 0.0  ;;  %v1065_v44 = vld [vmem:[%s2262_s0 + $0x100] sm:$0xff] }
  0x1f   :  { %v111_v50 = vadd.f32 %v110_v45, %v109_v47  ;;  %v142_v47 = vsel %vm80_vm0, %v1058_v39, 0.0 }
  0x21   :  { %v113_v53 = vadd.f32 %v112_v48, %v111_v50  ;;  %v1072_v48 = vld [vmem:[%s2262_s0 + $0x108] sm:$0xff] }
  0x23   :  { %v115_v56 = vadd.f32 %v114_v51, %v113_v53  ;;  %v144_v51 = vsel %vm80_vm0, %v1065_v44, 0.0  ;;  %v1079_v53 = vld [vmem:[%s2262_s0 + $0x110] sm:$0xff] }
  0x25   :  { %v117_v59 = vadd.f32 %v116_v54, %v115_v56  ;;  %v146_v56 = vsel %vm80_vm0, %v1072_v48, 0.0 }
  0x27   :  { %v119_v62 = vadd.f32 %v118_v57, %v117_v59  ;;  %v1086_v57 = vld [vmem:[%s2262_s0 + $0x118] sm:$0xff] }
  0x29   :  { %v121_v5 = vadd.f32 %v120_v60, %v119_v62  ;;  %v148_v60 = vsel %vm80_vm0, %v1079_v53, 0.0  ;;  %v1093_v62 = vld [vmem:[%s2262_s0 + $0x120] sm:$0xff] }
  0x2b   :  { %v123_v9 = vadd.f32 %v122_v63, %v121_v5  ;;  %v150_v5 = vsel %vm80_vm0, %v1086_v57, 0.0 }
  0x2d   :  { %v125_v14 = vadd.f32 %v124_v6, %v123_v9  ;;  %v1100_v6 = vld [vmem:[%s2262_s0 + $0x128] sm:$0xff] }
  0x2f   :  { %v127_v18 = vadd.f32 %v126_v11, %v125_v14  ;;  %v152_v11 = vsel %vm80_vm0, %v1093_v62, 0.0  ;;  %v1107_v14 = vld [vmem:[%s2262_s0 + $0x130] sm:$0xff] }
  0x31   :  { %v129_v23 = vadd.f32 %v128_v15, %v127_v18  ;;  %v154_v18 = vsel %vm80_vm0, %v1100_v6, 0.0 }
  0x33   :  { %v131_v27 = vadd.f32 %v130_v20, %v129_v23  ;;  %v1114_v20 = vld [vmem:[%s2262_s0 + $0x138] sm:$0xff] }
  0x35   :  { %v133_v32 = vadd.f32 %v132_v24, %v131_v27  ;;  %v156_v24 = vsel %vm80_vm0, %v1107_v14, 0.0  ;;  %v1121_v27 = vld [vmem:[%s2262_s0 + $0x140] sm:$0xff] }
  0x37   :  { %v135_v36 = vadd.f32 %v134_v29, %v133_v32  ;;  %v158_v32 = vsel %vm80_vm0, %v1114_v20, 0.0 }
  0x39   :  { %v137_v41 = vadd.f32 %v136_v33, %v135_v36  ;;  %v1128_v33 = vld [vmem:[%s2262_s0 + $0x148] sm:$0xff] }
  0x3b   :  { %v139_v45 = vadd.f32 %v138_v38, %v137_v41  ;;  %v160_v38 = vsel %vm80_vm0, %v1121_v27, 0.0  ;;  %v1135_v41 = vld [vmem:[%s2262_s0 + $0x150] sm:$0xff] }
  0x3d   :  { %v141_v50 = vadd.f32 %v140_v42, %v139_v45  ;;  %v162_v45 = vsel %vm80_vm0, %v1128_v33, 0.0 }
  0x3f   :  { %v143_v54 = vadd.f32 %v142_v47, %v141_v50  ;;  %v1142_v47 = vld [vmem:[%s2262_s0 + $0x158] sm:$0xff] }
  0x41   :  { %v145_v59 = vadd.f32 %v144_v51, %v143_v54  ;;  %v164_v51 = vsel %vm80_vm0, %v1135_v41, 0.0  ;;  %v1149_v54 = vld [vmem:[%s2262_s0 + $0x160] sm:$0xff] }
  0x43   :  { %v147_v63 = vadd.f32 %v146_v56, %v145_v59  ;;  %v166_v59 = vsel %vm80_vm0, %v1142_v47, 0.0 }
  0x45   :  { %v149_v9 = vadd.f32 %v148_v60, %v147_v63  ;;  %v1156_v60 = vld [vmem:[%s2262_s0 + $0x168] sm:$0xff] }
  0x47   :  { %v151_v15 = vadd.f32 %v150_v5, %v149_v9  ;;  %v168_v5 = vsel %vm80_vm0, %v1149_v54, 0.0  ;;  %v1163_v9 = vld [vmem:[%s2262_s0 + $0x170] sm:$0xff] }
  0x49   :  { %v153_v23 = vadd.f32 %v152_v11, %v151_v15  ;;  %v170_v15 = vsel %vm80_vm0, %v1156_v60, 0.0 }
  0x4b   :  { %v155_v29 = vadd.f32 %v154_v18, %v153_v23  ;;  %v1170_v18 = vld [vmem:[%s2262_s0 + $0x178] sm:$0xff] }
  0x4d   :  { %v157_v36 = vadd.f32 %v156_v24, %v155_v29  ;;  %v172_v24 = vsel %vm80_vm0, %v1163_v9, 0.0  ;;  %v1177_v29 = vld [vmem:[%s2262_s0 + $0x180] sm:$0xff] }
  0x4f   :  { %v159_v42 = vadd.f32 %v158_v32, %v157_v36  ;;  %v174_v36 = vsel %vm80_vm0, %v1170_v18, 0.0 }
  0x51   :  { %v161_v50 = vadd.f32 %v160_v38, %v159_v42  ;;  %v1184_v38 = vld [vmem:[%s2262_s0 + $0x188] sm:$0xff] }
  0x52   :  { %2301 = vst [vmem:[#allocation2_spill] sm:$0xff] %v1184_v38 }
  0x53   :  { %v163_v56 = vadd.f32 %v162_v45, %v161_v50  ;;  %v176_v45 = vsel %vm80_vm0, %v1177_v29, 0.0  ;;  %v1191_v50 = vld [vmem:[%s2262_s0 + $0x190] sm:$0xff] }
  0x54   :  { %2302 = vst [vmem:[#allocation3_spill] sm:$0xff] %v1191_v50 }
  0x55   :  { %v165_v63 = vadd.f32 %v164_v51, %v163_v56  ;;  %v178_v56 = vsel %vm80_vm0, %v1184_v38, 0.0 }
  0x57   :  { %v167_v11 = vadd.f32 %v166_v59, %v165_v63  ;;  %v1198_v59 = vld [vmem:[%s2262_s0 + $0x198] sm:$0xff] }
  0x58   :  { %2303 = vst [vmem:[#allocation4_spill] sm:$0xff] %v1198_v59 }
  0x59   :  { %v169_v23 = vadd.f32 %v168_v5, %v167_v11  ;;  %v180_v5 = vsel %vm80_vm0, %v1191_v50, 0.0  ;;  %v1205_v11 = vld [vmem:[%s2262_s0 + $0x1a0] sm:$0xff] }
  0x5a   :  { %2304 = vst [vmem:[#allocation5_spill] sm:$0xff] %v1205_v11 }
  0x5b   :  { %v171_v32 = vadd.f32 %v170_v15, %v169_v23  ;;  %v182_v23 = vsel %vm80_vm0, %v1198_v59, 0.0 }
  0x5d   :  { %v173_v42 = vadd.f32 %v172_v24, %v171_v32  ;;  %v1212_v24 = vld [vmem:[%s2262_s0 + $0x1a8] sm:$0xff] }
  0x5e   :  { %2305 = vst [vmem:[#allocation6_spill] sm:$0xff] %v1212_v24 }
  0x5f   :  { %v175_v51 = vadd.f32 %v174_v36, %v173_v42  ;;  %v184_v36 = vsel %vm80_vm0, %v1205_v11, 0.0  ;;  %v1219_v42 = vld [vmem:[%s2262_s0 + $0x1b0] sm:$0xff] }
  0x60   :  { %2306 = vst [vmem:[#allocation7_spill] sm:$0xff] %v1219_v42 }
  0x61   :  { %v177_v63 = vadd.f32 %v176_v45, %v175_v51  ;;  %v186_v51 = vsel %vm80_vm0, %v1212_v24, 0.0 }
  0x63   :  { %v179_v15 = vadd.f32 %v178_v56, %v177_v63  ;;  %v1226_v56 = vld [vmem:[%s2262_s0 + $0x1b8] sm:$0xff] }
  0x64   :  { %2307 = vst [vmem:[#allocation8_spill] sm:$0xff] %v1226_v56 }
  0x65   :  { %v181_v32 = vadd.f32 %v180_v5, %v179_v15  ;;  %v188_v5 = vsel %vm80_vm0, %v1219_v42, 0.0  ;;  %v1233_v15 = vld [vmem:[%s2262_s0 + $0x1c0] sm:$0xff] }
  0x66   :  { %2308 = vst [vmem:[#allocation9_spill] sm:$0xff] %v1233_v15 }
  0x67   :  { %v183_v45 = vadd.f32 %v182_v23, %v181_v32  ;;  %v190_v23 = vsel %vm80_vm0, %v1226_v56, 0.0  ;;  %v1240_v32 = vld [vmem:[%s2262_s0 + $0x1c8] sm:$0xff] }
  0x68   :  { %2309 = vst [vmem:[#allocation10_spill] sm:$0xff] %v1240_v32 }
  0x69   :  { %v185_v63 = vadd.f32 %v184_v36, %v183_v45  ;;  %v192_v36 = vsel %vm80_vm0, %v1233_v15, 0.0  ;;  %v1247_v45 = vld [vmem:[%s2262_s0 + $0x1d0] sm:$0xff] }
  0x6a   :  { %2310 = vst [vmem:[#allocation11_spill] sm:$0xff] %v1247_v45 }
  0x6b   :  { %v187_v11 = vadd.f32 %v186_v51, %v185_v63  ;;  %v194_v51 = vsel %vm80_vm0, %v1240_v32, 0.0  ;;  %v1254_v63 = vld [vmem:[%s2262_s0 + $0x1d8] sm:$0xff] }
  0x6c   :  { %2311 = vst [vmem:[#allocation12_spill] sm:$0xff] %v1254_v63  ;;  %v198_v15 = vsel %vm80_vm0, %v1254_v63, 0.0 }
  0x6d   :  { %v189_v24 = vadd.f32 %v188_v5, %v187_v11  ;;  %v196_v11 = vsel %vm80_vm0, %v1247_v45, 0.0 }
  0x6f   :  { %v191_v42 = vadd.f32 %v190_v23, %v189_v24  ;;  %v1263_v24 = vld [vmem:[%s2262_s0 + $0x1e0] sm:$0xff] }
  0x70   :  { %2312 = vst [vmem:[#allocation13_spill] sm:$0xff] %v1263_v24  ;;  %v200_v59 = vsel %vm80_vm0, %v1263_v24, 0.0 }
  0x71   :  { %v193_v56 = vadd.f32 %v192_v36, %v191_v42  ;;  %v1270_v42 = vld [vmem:[%s2262_s0 + $0x1e8] sm:$0xff] }
  0x72   :  { %2313 = vst [vmem:[#allocation14_spill] sm:$0xff] %v1270_v42 }
  0x73   :  { %v195_v5 = vadd.f32 %v194_v51, %v193_v56  ;;  %v202_v56 = vsel %vm80_vm0, %v1270_v42, 0.0  ;;  %v1277_v51 = vld [vmem:[%s2262_s0 + $0x1f0] sm:$0xff] }
  0x74   :  { %2314 = vst [vmem:[#allocation15_spill] sm:$0xff] %v1277_v51 }
  0x75   :  { %v197_v23 = vadd.f32 %v196_v11, %v195_v5  ;;  %v1284_v11 = vld [vmem:[%s2262_s0 + $0x1f8] sm:$0xff] }
  0x77   :  { %v199_v32 = vadd.f32 %v198_v15, %v197_v23  ;;  %v204_v15 = vsel %vm80_vm0, %v1277_v51, 0.0 }
  0x79   :  { %v201_v36 = vadd.f32 %v200_v59, %v199_v32  ;;  %v206_v59 = vsel %vm80_vm0, %v1284_v11, 0.0 }
  0x7b   :  { %v203_v63 = vadd.f32 %v202_v56, %v201_v36 }
  0x7d   :  { %v205_v5 = vadd.f32 %v204_v15, %v203_v63 }
  0x7f   :  { %v207_v32 = vadd.f32 %v206_v59, %v205_v5 }
  0x81   :  { %v208_v23 = vrot.slane %v207_v32, 4 }
  0x83   :  { %v209_v42 = vadd.f32 %v208_v23, %v207_v32 }
  0x85   :  { %v210_v24 = vrot.slane %v209_v42, 2 }
  0x87   :  { %v211_v45 = vadd.f32 %v210_v24, %v209_v42 }
  0x89   :  { %v212_v50 = vrot.slane %v211_v45, 1 }
  0x8b   :  { %v213_v38 = vadd.f32 %v212_v50, %v211_v45 }
  0x8d   :  { %v1288_v36 = vmul.f32 0.001953125, %v213_v38 }
  0x8f   :  { %v1292_v56 = vsub.f32 %v843_v0, %v1288_v36  ;;  %v1296_v51 = vsub.f32 %v848_v1, %v1288_v36  ;;  %v1300_v63 = vsub.f32 %v853_v2, %v1288_v36  ;;  %v1304_v15 = vsub.f32 %v858_v3, %v1288_v36 }
  0x90   :  { %v1308_v38 = vsub.f32 %v869_v7, %v1288_v36  ;;  %v1318_v2 = vsub.f32 %v876_v10, %v1288_v36  ;;  %v1324_v7 = vsub.f32 %v883_v13, %v1288_v36  ;;  %v1333_v10 = vsub.f32 %v890_v16, %v1288_v36 }
  0x91   :  { %v280_v0 = vmul.f32 %v1292_v56, %v1292_v56  ;;  %v281_v50 = vmul.f32 %v1296_v51, %v1296_v51  ;;  %v282_v1 = vmul.f32 %v1300_v63, %v1300_v63  ;;  %v283_v3 = vmul.f32 %v1304_v15, %v1304_v15 }
  0x92   :  { %2315 = vst [vmem:[#allocation16_spill] sm:$0xff] %v1308_v38  ;;  %v284_v45 = vmul.f32 %v1308_v38, %v1308_v38  ;;  %v285_v32 = vmul.f32 %v1318_v2, %v1318_v2  ;;  %v1340_v38 = vsub.f32 %v897_v19, %v1288_v36  ;;  %v1347_v16 = vsub.f32 %v904_v22, %v1288_v36 }
  0x93   :  { %v344_v24 = vsel %vm80_vm0, %v280_v0, 0.0  ;;  %v345_v42 = vsel %vm80_vm0, %v281_v50, 0.0  ;;  %v347_v5 = vsel %vm80_vm0, %v282_v1, 0.0  ;;  %v349_v13 = vsel %vm80_vm0, %v283_v3, 0.0 }
  0x94   :  { %v346_v59 = vadd.f32 %v345_v42, %v344_v24  ;;  %v286_v0 = vmul.f32 %v1324_v7, %v1324_v7  ;;  %v351_v50 = vsel %vm80_vm0, %v284_v45, 0.0  ;;  %v287_v24 = vmul.f32 %v1333_v10, %v1333_v10 }
  0x95   :  { %v353_v3 = vsel %vm80_vm0, %v285_v32, 0.0  ;;  %v1354_v19 = vsub.f32 %v911_v25, %v1288_v36  ;;  %v1361_v22 = vsub.f32 %v918_v28, %v1288_v36  ;;  %v1368_v25 = vsub.f32 %v925_v31, %v1288_v36 }
  0x96   :  { %v348_v23 = vadd.f32 %v347_v5, %v346_v59  ;;  %v288_v5 = vmul.f32 %v1340_v38, %v1340_v38  ;;  %v355_v45 = vsel %vm80_vm0, %v286_v0, 0.0  ;;  %v357_v32 = vsel %vm80_vm0, %v287_v24, 0.0 }
  0x97   :  { %v1375_v28 = vsub.f32 %v932_v34, %v1288_v36  ;;  %v1382_v31 = vsub.f32 %v939_v37, %v1288_v36  ;;  %v1389_v34 = vsub.f32 %v946_v40, %v1288_v36  ;;  %v1396_v37 = vsub.f32 %v953_v43, %v1288_v36 }
  0x98   :  { %v350_v1 = vadd.f32 %v349_v13, %v348_v23  ;;  %v289_v13 = vmul.f32 %v1347_v16, %v1347_v16  ;;  %v359_v0 = vsel %vm80_vm0, %v288_v5, 0.0  ;;  %v1403_v40 = vsub.f32 %v960_v46, %v1288_v36 }
  0x99   :  { %v1410_v43 = vsub.f32 %v967_v49, %v1288_v36  ;;  %v1417_v46 = vsub.f32 %v974_v52, %v1288_v36  ;;  %v1424_v49 = vsub.f32 %v981_v55, %v1288_v36  ;;  %v1431_v52 = vsub.f32 %v988_v58, %v1288_v36 }
  0x9a   :  { %v352_v42 = vadd.f32 %v351_v50, %v350_v1  ;;  %v290_v50 = vmul.f32 %v1354_v19, %v1354_v19  ;;  %v361_v24 = vsel %vm80_vm0, %v289_v13, 0.0  ;;  %v1438_v55 = vsub.f32 %v995_v61, %v1288_v36 }
  0x9b   :  { %v1445_v58 = vsub.f32 %v1002_v4, %v1288_v36  ;;  %v1452_v61 = vsub.f32 %v1009_v8, %v1288_v36  ;;  %v1459_v4 = vsub.f32 %v1016_v12, %v1288_v36  ;;  %v1466_v8 = vsub.f32 %v1023_v17, %v1288_v36 }
  0x9c   :  { %v354_v59 = vadd.f32 %v353_v3, %v352_v42  ;;  %v291_v3 = vmul.f32 %v1361_v22, %v1361_v22  ;;  %v363_v5 = vsel %vm80_vm0, %v290_v50, 0.0  ;;  %v1473_v12 = vsub.f32 %v1030_v21, %v1288_v36 }
  0x9d   :  { %v1480_v17 = vsub.f32 %v1037_v26, %v1288_v36  ;;  %v1487_v21 = vsub.f32 %v1044_v30, %v1288_v36  ;;  %v1494_v26 = vsub.f32 %v1051_v35, %v1288_v36  ;;  %v1501_v30 = vsub.f32 %v1058_v39, %v1288_v36 }
  0x9e   :  { %v356_v23 = vadd.f32 %v355_v45, %v354_v59  ;;  %v292_v45 = vmul.f32 %v1368_v25, %v1368_v25  ;;  %v365_v13 = vsel %vm80_vm0, %v291_v3, 0.0  ;;  %v1508_v35 = vsub.f32 %v1065_v44, %v1288_v36 }
  0x9f   :  { %v1515_v39 = vsub.f32 %v1072_v48, %v1288_v36  ;;  %v1522_v44 = vsub.f32 %v1079_v53, %v1288_v36  ;;  %v1529_v48 = vsub.f32 %v1086_v57, %v1288_v36  ;;  %v1536_v53 = vsub.f32 %v1093_v62, %v1288_v36 }
  0xa0   :  { %v358_v1 = vadd.f32 %v357_v32, %v356_v23  ;;  %v293_v32 = vmul.f32 %v1375_v28, %v1375_v28  ;;  %v367_v50 = vsel %vm80_vm0, %v292_v45, 0.0  ;;  %v1543_v57 = vsub.f32 %v1100_v6, %v1288_v36 }
  0xa1   :  { %v1550_v62 = vsub.f32 %v1107_v14, %v1288_v36  ;;  %v1557_v6 = vsub.f32 %v1114_v20, %v1288_v36  ;;  %v1564_v14 = vsub.f32 %v1121_v27, %v1288_v36  ;;  %v1571_v20 = vsub.f32 %v1128_v33, %v1288_v36 }
  0xa2   :  { %v360_v42 = vadd.f32 %v359_v0, %v358_v1  ;;  %v294_v0 = vmul.f32 %v1382_v31, %v1382_v31  ;;  %v369_v3 = vsel %vm80_vm0, %v293_v32, 0.0  ;;  %v1578_v27 = vsub.f32 %v1135_v41, %v1288_v36 }
  0xa3   :  { %v1585_v33 = vsub.f32 %v1142_v47, %v1288_v36  ;;  %v1592_v41 = vsub.f32 %v1149_v54, %v1288_v36  ;;  %v1599_v47 = vsub.f32 %v1156_v60, %v1288_v36  ;;  %v1606_v54 = vsub.f32 %v1163_v9, %v1288_v36 }
  0xa4   :  { %v362_v59 = vadd.f32 %v361_v24, %v360_v42  ;;  %v295_v24 = vmul.f32 %v1389_v34, %v1389_v34  ;;  %v371_v45 = vsel %vm80_vm0, %v294_v0, 0.0  ;;  %v1613_v60 = vsub.f32 %v1170_v18, %v1288_v36 }
  0xa5   :  { %2316 = vst [vmem:[#allocation17_spill] sm:$0xff] %v1592_v41  ;;  %2317 = vst [vmem:[#allocation18_spill] sm:$0xff] %v1599_v47  ;;  %v1620_v9 = vsub.f32 %v1177_v29, %v1288_v36 }
  0xa6   :  { %v364_v23 = vadd.f32 %v363_v5, %v362_v59  ;;  %v296_v5 = vmul.f32 %v1396_v37, %v1396_v37  ;;  %v373_v32 = vsel %vm80_vm0, %v295_v24, 0.0  ;;  %2318 = vst [vmem:[#allocation19_spill] sm:$0xff] %v1606_v54  ;;  %2319 = vst [vmem:[#allocation20_spill] sm:$0xff] %v1613_v60 }
  0xa7   :  { %2320 = vst [vmem:[#allocation21_spill] sm:$0xff] %v1620_v9 }
  0xa8   :  { %v366_v1 = vadd.f32 %v365_v13, %v364_v23  ;;  %v297_v13 = vmul.f32 %v1403_v40, %v1403_v40  ;;  %v375_v0 = vsel %vm80_vm0, %v296_v5, 0.0 }
  0xaa   :  { %v368_v42 = vadd.f32 %v367_v50, %v366_v1  ;;  %v298_v50 = vmul.f32 %v1410_v43, %v1410_v43  ;;  %v377_v24 = vsel %vm80_vm0, %v297_v13, 0.0 }
  0xac   :  { %v370_v59 = vadd.f32 %v369_v3, %v368_v42  ;;  %v299_v3 = vmul.f32 %v1417_v46, %v1417_v46  ;;  %v379_v5 = vsel %vm80_vm0, %v298_v50, 0.0 }
  0xae   :  { %v372_v23 = vadd.f32 %v371_v45, %v370_v59  ;;  %v300_v45 = vmul.f32 %v1424_v49, %v1424_v49  ;;  %v381_v13 = vsel %vm80_vm0, %v299_v3, 0.0 }
  0xb0   :  { %v374_v1 = vadd.f32 %v373_v32, %v372_v23  ;;  %v301_v32 = vmul.f32 %v1431_v52, %v1431_v52  ;;  %v383_v50 = vsel %vm80_vm0, %v300_v45, 0.0 }
  0xb2   :  { %v376_v42 = vadd.f32 %v375_v0, %v374_v1  ;;  %v302_v0 = vmul.f32 %v1438_v55, %v1438_v55  ;;  %v385_v3 = vsel %vm80_vm0, %v301_v32, 0.0 }
  0xb4   :  { %v378_v59 = vadd.f32 %v377_v24, %v376_v42  ;;  %v303_v24 = vmul.f32 %v1445_v58, %v1445_v58  ;;  %v387_v45 = vsel %vm80_vm0, %v302_v0, 0.0 }
  0xb6   :  { %v380_v23 = vadd.f32 %v379_v5, %v378_v59  ;;  %v304_v5 = vmul.f32 %v1452_v61, %v1452_v61  ;;  %v389_v32 = vsel %vm80_vm0, %v303_v24, 0.0 }
  0xb8   :  { %v382_v1 = vadd.f32 %v381_v13, %v380_v23  ;;  %v305_v13 = vmul.f32 %v1459_v4, %v1459_v4  ;;  %v391_v0 = vsel %vm80_vm0, %v304_v5, 0.0 }
  0xba   :  { %v384_v42 = vadd.f32 %v383_v50, %v382_v1  ;;  %v306_v50 = vmul.f32 %v1466_v8, %v1466_v8  ;;  %v393_v24 = vsel %vm80_vm0, %v305_v13, 0.0 }
  0xbc   :  { %v386_v59 = vadd.f32 %v385_v3, %v384_v42  ;;  %v307_v3 = vmul.f32 %v1473_v12, %v1473_v12  ;;  %v395_v5 = vsel %vm80_vm0, %v306_v50, 0.0 }
  0xbe   :  { %v388_v23 = vadd.f32 %v387_v45, %v386_v59  ;;  %v308_v45 = vmul.f32 %v1480_v17, %v1480_v17  ;;  %v397_v13 = vsel %vm80_vm0, %v307_v3, 0.0 }
  0xc0   :  { %v390_v1 = vadd.f32 %v389_v32, %v388_v23  ;;  %v309_v32 = vmul.f32 %v1487_v21, %v1487_v21  ;;  %v399_v50 = vsel %vm80_vm0, %v308_v45, 0.0 }
  0xc2   :  { %v392_v42 = vadd.f32 %v391_v0, %v390_v1  ;;  %v310_v0 = vmul.f32 %v1494_v26, %v1494_v26  ;;  %v401_v3 = vsel %vm80_vm0, %v309_v32, 0.0 }
  0xc4   :  { %v394_v59 = vadd.f32 %v393_v24, %v392_v42  ;;  %v311_v24 = vmul.f32 %v1501_v30, %v1501_v30  ;;  %v403_v45 = vsel %vm80_vm0, %v310_v0, 0.0 }
  0xc6   :  { %v396_v23 = vadd.f32 %v395_v5, %v394_v59  ;;  %v312_v5 = vmul.f32 %v1508_v35, %v1508_v35  ;;  %v405_v32 = vsel %vm80_vm0, %v311_v24, 0.0 }
  0xc8   :  { %v398_v1 = vadd.f32 %v397_v13, %v396_v23  ;;  %v313_v13 = vmul.f32 %v1515_v39, %v1515_v39  ;;  %v407_v0 = vsel %vm80_vm0, %v312_v5, 0.0 }
  0xca   :  { %v400_v42 = vadd.f32 %v399_v50, %v398_v1  ;;  %v314_v50 = vmul.f32 %v1522_v44, %v1522_v44  ;;  %v409_v24 = vsel %vm80_vm0, %v313_v13, 0.0 }
  0xcc   :  { %v402_v59 = vadd.f32 %v401_v3, %v400_v42  ;;  %v315_v3 = vmul.f32 %v1529_v48, %v1529_v48  ;;  %v411_v5 = vsel %vm80_vm0, %v314_v50, 0.0 }
  0xce   :  { %v404_v23 = vadd.f32 %v403_v45, %v402_v59  ;;  %v316_v45 = vmul.f32 %v1536_v53, %v1536_v53  ;;  %v413_v13 = vsel %vm80_vm0, %v315_v3, 0.0 }
  0xd0   :  { %v406_v1 = vadd.f32 %v405_v32, %v404_v23  ;;  %v317_v32 = vmul.f32 %v1543_v57, %v1543_v57  ;;  %v415_v50 = vsel %vm80_vm0, %v316_v45, 0.0 }
  0xd2   :  { %v408_v42 = vadd.f32 %v407_v0, %v406_v1  ;;  %v318_v0 = vmul.f32 %v1550_v62, %v1550_v62  ;;  %v417_v3 = vsel %vm80_vm0, %v317_v32, 0.0 }
  0xd4   :  { %v410_v59 = vadd.f32 %v409_v24, %v408_v42  ;;  %v319_v24 = vmul.f32 %v1557_v6, %v1557_v6  ;;  %v419_v45 = vsel %vm80_vm0, %v318_v0, 0.0 }
  0xd6   :  { %v412_v23 = vadd.f32 %v411_v5, %v410_v59  ;;  %v320_v5 = vmul.f32 %v1564_v14, %v1564_v14  ;;  %v421_v32 = vsel %vm80_vm0, %v319_v24, 0.0 }
  0xd8   :  { %v414_v1 = vadd.f32 %v413_v13, %v412_v23  ;;  %v321_v13 = vmul.f32 %v1571_v20, %v1571_v20  ;;  %v423_v0 = vsel %vm80_vm0, %v320_v5, 0.0 }
  0xda   :  { %v416_v42 = vadd.f32 %v415_v50, %v414_v1  ;;  %v322_v50 = vmul.f32 %v1578_v27, %v1578_v27  ;;  %v425_v24 = vsel %vm80_vm0, %v321_v13, 0.0 }
  0xdc   :  { %v418_v59 = vadd.f32 %v417_v3, %v416_v42  ;;  %v323_v3 = vmul.f32 %v1585_v33, %v1585_v33  ;;  %v427_v5 = vsel %vm80_vm0, %v322_v50, 0.0 }
  0xde   :  { %v420_v23 = vadd.f32 %v419_v45, %v418_v59  ;;  %v324_v45 = vmul.f32 %v1592_v41, %v1592_v41  ;;  %v429_v13 = vsel %vm80_vm0, %v323_v3, 0.0 }
  0xe0   :  { %v422_v1 = vadd.f32 %v421_v32, %v420_v23  ;;  %v325_v32 = vmul.f32 %v1599_v47, %v1599_v47  ;;  %v431_v50 = vsel %vm80_vm0, %v324_v45, 0.0 }
  0xe2   :  { %v424_v42 = vadd.f32 %v423_v0, %v422_v1  ;;  %v326_v0 = vmul.f32 %v1606_v54, %v1606_v54  ;;  %v433_v3 = vsel %vm80_vm0, %v325_v32, 0.0  ;;  %v328_v54 = vmul.f32 %v1620_v9, %v1620_v9 }
  0xe4   :  { %v426_v59 = vadd.f32 %v425_v24, %v424_v42  ;;  %v2321_v24 = vld [vmem:[#allocation2_spill] sm:$0xff]  ;;  %v327_v42 = vmul.f32 %v1613_v60, %v1613_v60  ;;  %v435_v45 = vsel %vm80_vm0, %v326_v0, 0.0  ;;  %v439_v0 = vsel %vm80_vm0, %v328_v54, 0.0 }
  0xe5   :  { %v1627_v18 = vsub.f32 %v2321_v24, %v1288_v36 }
  0xe6   :  { %v428_v23 = vadd.f32 %v427_v5, %v426_v59  ;;  %v2323_v59 = vld [vmem:[#allocation3_spill] sm:$0xff]  ;;  %v437_v32 = vsel %vm80_vm0, %v327_v42, 0.0 }
  0xe7   :  { %2322 = vst [vmem:[#allocation2_spill] sm:$0xff] %v1627_v18  ;;  %v1634_v29 = vsub.f32 %v2323_v59, %v1288_v36  ;;  %v329_v60 = vmul.f32 %v1627_v18, %v1627_v18 }
  0xe8   :  { %v430_v1 = vadd.f32 %v429_v13, %v428_v23  ;;  %v2325_v23 = vld [vmem:[#allocation4_spill] sm:$0xff] }
  0xe9   :  { %2324 = vst [vmem:[#allocation3_spill] sm:$0xff] %v1634_v29  ;;  %v1641_v24 = vsub.f32 %v2325_v23, %v1288_v36  ;;  %v330_v9 = vmul.f32 %v1634_v29, %v1634_v29  ;;  %v441_v42 = vsel %vm80_vm0, %v329_v60, 0.0 }
  0xea   :  { %v432_v5 = vadd.f32 %v431_v50, %v430_v1  ;;  %v2327_v1 = vld [vmem:[#allocation5_spill] sm:$0xff] }
  0xeb   :  { %2326 = vst [vmem:[#allocation4_spill] sm:$0xff] %v1641_v24  ;;  %v1648_v59 = vsub.f32 %v2327_v1, %v1288_v36  ;;  %v331_v18 = vmul.f32 %v1641_v24, %v1641_v24  ;;  %v443_v54 = vsel %vm80_vm0, %v330_v9, 0.0 }
  0xec   :  { %v434_v13 = vadd.f32 %v433_v3, %v432_v5  ;;  %v2329_v5 = vld [vmem:[#allocation6_spill] sm:$0xff] }
  0xed   :  { %2328 = vst [vmem:[#allocation5_spill] sm:$0xff] %v1648_v59  ;;  %v1655_v23 = vsub.f32 %v2329_v5, %v1288_v36  ;;  %v332_v29 = vmul.f32 %v1648_v59, %v1648_v59  ;;  %v445_v60 = vsel %vm80_vm0, %v331_v18, 0.0 }
  0xee   :  { %v436_v50 = vadd.f32 %v435_v45, %v434_v13  ;;  %v2331_v13 = vld [vmem:[#allocation7_spill] sm:$0xff] }
  0xef   :  { %2330 = vst [vmem:[#allocation6_spill] sm:$0xff] %v1655_v23  ;;  %v1662_v1 = vsub.f32 %v2331_v13, %v1288_v36  ;;  %v333_v24 = vmul.f32 %v1655_v23, %v1655_v23  ;;  %v447_v9 = vsel %vm80_vm0, %v332_v29, 0.0 }
  0xf0   :  { %v438_v3 = vadd.f32 %v437_v32, %v436_v50  ;;  %v2333_v50 = vld [vmem:[#allocation8_spill] sm:$0xff] }
  0xf1   :  { %2332 = vst [vmem:[#allocation7_spill] sm:$0xff] %v1662_v1  ;;  %v1669_v5 = vsub.f32 %v2333_v50, %v1288_v36  ;;  %v334_v59 = vmul.f32 %v1662_v1, %v1662_v1  ;;  %v449_v18 = vsel %vm80_vm0, %v333_v24, 0.0 }
  0xf2   :  { %v440_v45 = vadd.f32 %v439_v0, %v438_v3  ;;  %v2335_v3 = vld [vmem:[#allocation9_spill] sm:$0xff] }
  0xf3   :  { %2334 = vst [vmem:[#allocation8_spill] sm:$0xff] %v1669_v5  ;;  %v1676_v13 = vsub.f32 %v2335_v3, %v1288_v36  ;;  %v335_v23 = vmul.f32 %v1669_v5, %v1669_v5  ;;  %v451_v29 = vsel %vm80_vm0, %v334_v59, 0.0 }
  0xf4   :  { %v442_v32 = vadd.f32 %v441_v42, %v440_v45  ;;  %v2337_v45 = vld [vmem:[#allocation10_spill] sm:$0xff] }
  0xf5   :  { %2336 = vst [vmem:[#allocation9_spill] sm:$0xff] %v1676_v13  ;;  %v1683_v50 = vsub.f32 %v2337_v45, %v1288_v36  ;;  %v336_v1 = vmul.f32 %v1676_v13, %v1676_v13  ;;  %v453_v24 = vsel %vm80_vm0, %v335_v23, 0.0 }
  0xf6   :  { %v444_v0 = vadd.f32 %v443_v54, %v442_v32  ;;  %v2339_v32 = vld [vmem:[#allocation11_spill] sm:$0xff] }
  0xf7   :  { %2338 = vst [vmem:[#allocation10_spill] sm:$0xff] %v1683_v50  ;;  %v1690_v3 = vsub.f32 %v2339_v32, %v1288_v36  ;;  %v337_v5 = vmul.f32 %v1683_v50, %v1683_v50  ;;  %v455_v59 = vsel %vm80_vm0, %v336_v1, 0.0 }
  0xf8   :  { %v446_v42 = vadd.f32 %v445_v60, %v444_v0  ;;  %v2341_v0 = vld [vmem:[#allocation12_spill] sm:$0xff] }
  0xf9   :  { %2340 = vst [vmem:[#allocation11_spill] sm:$0xff] %v1690_v3  ;;  %v1697_v45 = vsub.f32 %v2341_v0, %v1288_v36  ;;  %v338_v13 = vmul.f32 %v1690_v3, %v1690_v3  ;;  %v457_v23 = vsel %vm80_vm0, %v337_v5, 0.0 }
  0xfa   :  { %v448_v54 = vadd.f32 %v447_v9, %v446_v42  ;;  %v2343_v42 = vld [vmem:[#allocation13_spill] sm:$0xff] }
  0xfb   :  { %2342 = vst [vmem:[#allocation12_spill] sm:$0xff] %v1697_v45  ;;  %v1704_v32 = vsub.f32 %v2343_v42, %v1288_v36  ;;  %v339_v50 = vmul.f32 %v1697_v45, %v1697_v45  ;;  %v459_v1 = vsel %vm80_vm0, %v338_v13, 0.0 }
  0xfc   :  { %v450_v60 = vadd.f32 %v449_v18, %v448_v54  ;;  %v2345_v54 = vld [vmem:[#allocation14_spill] sm:$0xff] }
  0xfd   :  { %2344 = vst [vmem:[#allocation13_spill] sm:$0xff] %v1704_v32  ;;  %v1711_v0 = vsub.f32 %v2345_v54, %v1288_v36  ;;  %v340_v3 = vmul.f32 %v1704_v32, %v1704_v32  ;;  %v461_v5 = vsel %vm80_vm0, %v339_v50, 0.0 }
  0xfe   :  { %v452_v9 = vadd.f32 %v451_v29, %v450_v60  ;;  %v2347_v60 = vld [vmem:[#allocation15_spill] sm:$0xff] }
  0xff   :  { %2346 = vst [vmem:[#allocation14_spill] sm:$0xff] %v1711_v0  ;;  %v1718_v42 = vsub.f32 %v2347_v60, %v1288_v36  ;;  %v341_v54 = vmul.f32 %v1711_v0, %v1711_v0  ;;  %v463_v60 = vsel %vm80_vm0, %v340_v3, 0.0 }
 0x100   :  { %v454_v18 = vadd.f32 %v453_v24, %v452_v9  ;;  %v1725_v9 = vsub.f32 %v1284_v11, %v1288_v36 }
 0x101   :  { %2348 = vst [vmem:[#allocation15_spill] sm:$0xff] %v1718_v42 }
 0x102   :  { %v456_v29 = vadd.f32 %v455_v59, %v454_v18  ;;  %2349 = vst [vmem:[#allocation22_spill] sm:$0xff] %v1725_v9  ;;  %v342_v18 = vmul.f32 %v1718_v42, %v1718_v42  ;;  %v343_v13 = vmul.f32 %v1725_v9, %v1725_v9 }
 0x104   :  { %v458_v24 = vadd.f32 %v457_v23, %v456_v29  ;;  %v465_v23 = vsel %vm80_vm0, %v341_v54, 0.0  ;;  %v467_v11 = vsel %vm80_vm0, %v342_v18, 0.0  ;;  %v469_v0 = vsel %vm80_vm0, %v343_v13, 0.0 }
 0x106   :  { %v460_v59 = vadd.f32 %v459_v1, %v458_v24 }
 0x108   :  { %v462_v45 = vadd.f32 %v461_v5, %v460_v59 }
 0x10a   :  { %v464_v29 = vadd.f32 %v463_v60, %v462_v45  ;;  %v1743_v45 = vld [vmem:[%s2263_s1] ss:$0 sm:$0xff] }
 0x10c   :  { %v466_v36 = vadd.f32 %v465_v23, %v464_v29 }
 0x10e   :  { %v468_v32 = vadd.f32 %v467_v11, %v466_v36 }
 0x110   :  { %v470_v50 = vadd.f32 %v469_v0, %v468_v32  ;;  %v1756_v0 = vld [vmem:[%s2264_s2] ss:$0 sm:$0xff] }
 0x112   :  { %v471_v1 = vrot.slane %v470_v50, 4 }
 0x114   :  { %v472_v24 = vadd.f32 %v471_v1, %v470_v50 }
 0x116   :  { %v473_v47 = vrot.slane %v472_v24, 2 }
 0x118   :  { %v474_v42 = vadd.f32 %v473_v47, %v472_v24 }
 0x11a   :  { %v475_v41 = vrot.slane %v474_v42, 1 }
 0x11c   :  { %v476_v3 = vadd.f32 %v475_v41, %v474_v42  ;;  %v2350_v42 = vld [vmem:[#allocation16_spill] sm:$0xff] }
 0x11e   :  { %v477_v5 = vmul.f32 0.001953125, %v476_v3 }
 0x120   :  { %v478_v59 = vadd.f32 1e-05, %v477_v5 }
 0x122   :  { %818 = vrsqrt.f32 %v478_v59 }
 0x12f   :  { %v1738_v9 = vpop.eup %818 }
 0x130   :  { %v480_v54 = vmul.f32 %v1738_v9, %v1292_v56  ;;  %v481_v32 = vmul.f32 %v1738_v9, %v1296_v51  ;;  %v482_v47 = vmul.f32 %v1738_v9, %v1300_v63  ;;  %v483_v41 = vmul.f32 %v1738_v9, %v1304_v15 }
 0x131   :  { %v484_v18 = vmul.f32 %v1738_v9, %v2350_v42  ;;  %v485_v56 = vmul.f32 %v1738_v9, %v1318_v2  ;;  %v486_v51 = vmul.f32 %v1738_v9, %v1324_v7  ;;  %v487_v63 = vmul.f32 %v1738_v9, %v1333_v10 }
 0x132   :  { %v550_v60 = vmul.f32 %v1743_v45, %v480_v54  ;;  %v551_v15 = vmul.f32 %v1743_v45, %v481_v32  ;;  %v552_v13 = vmul.f32 %v1743_v45, %v482_v47  ;;  %v553_v23 = vmul.f32 %v1743_v45, %v483_v41 }
 0x133   :  { %v554_v29 = vmul.f32 %v1743_v45, %v484_v18  ;;  %v555_v11 = vmul.f32 %v1743_v45, %v485_v56  ;;  %v556_v2 = vmul.f32 %v1743_v45, %v486_v51  ;;  %v557_v36 = vmul.f32 %v1743_v45, %v487_v63 }
 0x134   :  { %v620_v7 = vadd.f32 %v1756_v0, %v550_v60  ;;  %v621_v10 = vadd.f32 %v1756_v0, %v551_v15  ;;  %v622_v50 = vadd.f32 %v1756_v0, %v552_v13  ;;  %v623_v1 = vadd.f32 %v1756_v0, %v553_v23 }
 0x135   :  { %v624_v24 = vadd.f32 %v1756_v0, %v554_v29  ;;  %v625_v3 = vadd.f32 %v1756_v0, %v555_v11  ;;  %v626_v5 = vadd.f32 %v1756_v0, %v556_v2  ;;  %v627_v59 = vadd.f32 %v1756_v0, %v557_v36 }
 0x136   :  { %v684_v54 = vmax.f32 %v620_v7, 0.0  ;;  %v685_v32 = vmax.f32 %v621_v10, 0.0  ;;  %v686_v47 = vmax.f32 %v622_v50, 0.0  ;;  %v687_v41 = vmax.f32 %v623_v1, 0.0 }
 0x137   :  { %v688_v42 = vmax.f32 %v624_v24, 0.0  ;;  %v689_v18 = vmax.f32 %v625_v3, 0.0  ;;  %v690_v56 = vmax.f32 %v626_v5, 0.0  ;;  %v691_v51 = vmax.f32 %v627_v59, 0.0 }
 0x138   :  { %748 = vst.msk [vmem:[%s2265_s3] sm:$0xff] %vm80_vm0, %v684_v54  ;;  %749 = vst.msk [vmem:[%s2265_s3 + $0x8] sm:$0xff] %vm80_vm0, %v685_v32  ;;  %v488_v63 = vmul.f32 %v1738_v9, %v1340_v38  ;;  %v489_v60 = vmul.f32 %v1738_v9, %v1347_v16  ;;  %v490_v15 = vmul.f32 %v1738_v9, %v1354_v19 }
 0x139   :  { %750 = vst.msk [vmem:[%s2265_s3 + $0x10] sm:$0xff] %vm80_vm0, %v686_v47  ;;  %751 = vst.msk [vmem:[%s2265_s3 + $0x18] sm:$0xff] %vm80_vm0, %v687_v41  ;;  %v491_v13 = vmul.f32 %v1738_v9, %v1361_v22  ;;  %v492_v38 = vmul.f32 %v1738_v9, %v1368_v25  ;;  %v493_v16 = vmul.f32 %v1738_v9, %v1375_v28 }
 0x13a   :  { %752 = vst.msk [vmem:[%s2265_s3 + $0x20] sm:$0xff] %vm80_vm0, %v688_v42  ;;  %753 = vst.msk [vmem:[%s2265_s3 + $0x28] sm:$0xff] %vm80_vm0, %v689_v18  ;;  %v494_v19 = vmul.f32 %v1738_v9, %v1382_v31  ;;  %v495_v22 = vmul.f32 %v1738_v9, %v1389_v34  ;;  %v558_v23 = vmul.f32 %v1743_v45, %v488_v63 }
 0x13b   :  { %754 = vst.msk [vmem:[%s2265_s3 + $0x30] sm:$0xff] %vm80_vm0, %v690_v56  ;;  %755 = vst.msk [vmem:[%s2265_s3 + $0x38] sm:$0xff] %vm80_vm0, %v691_v51  ;;  %v559_v29 = vmul.f32 %v1743_v45, %v489_v60  ;;  %v560_v11 = vmul.f32 %v1743_v45, %v490_v15  ;;  %v561_v2 = vmul.f32 %v1743_v45, %v491_v13 }
 0x13c   :  { %v562_v36 = vmul.f32 %v1743_v45, %v492_v38  ;;  %v563_v25 = vmul.f32 %v1743_v45, %v493_v16  ;;  %v564_v28 = vmul.f32 %v1743_v45, %v494_v19  ;;  %v565_v7 = vmul.f32 %v1743_v45, %v495_v22 }
 0x13d   :  { %v628_v31 = vadd.f32 %v1756_v0, %v558_v23  ;;  %v629_v34 = vadd.f32 %v1756_v0, %v559_v29  ;;  %v630_v10 = vadd.f32 %v1756_v0, %v560_v11  ;;  %v631_v50 = vadd.f32 %v1756_v0, %v561_v2 }
 0x13e   :  { %v632_v1 = vadd.f32 %v1756_v0, %v562_v36  ;;  %v633_v24 = vadd.f32 %v1756_v0, %v563_v25  ;;  %v634_v3 = vadd.f32 %v1756_v0, %v564_v28  ;;  %v635_v5 = vadd.f32 %v1756_v0, %v565_v7 }
 0x13f   :  { %v692_v59 = vmax.f32 %v628_v31, 0.0  ;;  %v693_v54 = vmax.f32 %v629_v34, 0.0  ;;  %v694_v32 = vmax.f32 %v630_v10, 0.0  ;;  %v695_v47 = vmax.f32 %v631_v50, 0.0 }
 0x140   :  { %v696_v41 = vmax.f32 %v632_v1, 0.0  ;;  %v697_v42 = vmax.f32 %v633_v24, 0.0  ;;  %v698_v18 = vmax.f32 %v634_v3, 0.0  ;;  %v699_v56 = vmax.f32 %v635_v5, 0.0 }
 0x141   :  { %756 = vst.msk [vmem:[%s2265_s3 + $0x40] sm:$0xff] %vm80_vm0, %v692_v59  ;;  %757 = vst.msk [vmem:[%s2265_s3 + $0x48] sm:$0xff] %vm80_vm0, %v693_v54  ;;  %v496_v51 = vmul.f32 %v1738_v9, %v1396_v37  ;;  %v497_v63 = vmul.f32 %v1738_v9, %v1403_v40  ;;  %v498_v60 = vmul.f32 %v1738_v9, %v1410_v43 }
 0x142   :  { %758 = vst.msk [vmem:[%s2265_s3 + $0x50] sm:$0xff] %vm80_vm0, %v694_v32  ;;  %759 = vst.msk [vmem:[%s2265_s3 + $0x58] sm:$0xff] %vm80_vm0, %v695_v47  ;;  %v499_v15 = vmul.f32 %v1738_v9, %v1417_v46  ;;  %v500_v37 = vmul.f32 %v1738_v9, %v1424_v49  ;;  %v501_v40 = vmul.f32 %v1738_v9, %v1431_v52 }
 0x143   :  { %760 = vst.msk [vmem:[%s2265_s3 + $0x60] sm:$0xff] %vm80_vm0, %v696_v41  ;;  %761 = vst.msk [vmem:[%s2265_s3 + $0x68] sm:$0xff] %vm80_vm0, %v697_v42  ;;  %v502_v43 = vmul.f32 %v1738_v9, %v1438_v55  ;;  %v503_v46 = vmul.f32 %v1738_v9, %v1445_v58  ;;  %v566_v13 = vmul.f32 %v1743_v45, %v496_v51 }
 0x144   :  { %762 = vst.msk [vmem:[%s2265_s3 + $0x70] sm:$0xff] %vm80_vm0, %v698_v18  ;;  %763 = vst.msk [vmem:[%s2265_s3 + $0x78] sm:$0xff] %vm80_vm0, %v699_v56  ;;  %v567_v38 = vmul.f32 %v1743_v45, %v497_v63  ;;  %v568_v16 = vmul.f32 %v1743_v45, %v498_v60  ;;  %v569_v19 = vmul.f32 %v1743_v45, %v499_v15 }
 0x145   :  { %v570_v22 = vmul.f32 %v1743_v45, %v500_v37  ;;  %v571_v49 = vmul.f32 %v1743_v45, %v501_v40  ;;  %v572_v52 = vmul.f32 %v1743_v45, %v502_v43  ;;  %v573_v23 = vmul.f32 %v1743_v45, %v503_v46 }
 0x146   :  { %v636_v55 = vadd.f32 %v1756_v0, %v566_v13  ;;  %v637_v58 = vadd.f32 %v1756_v0, %v567_v38  ;;  %v638_v29 = vadd.f32 %v1756_v0, %v568_v16  ;;  %v639_v11 = vadd.f32 %v1756_v0, %v569_v19 }
 0x147   :  { %v640_v2 = vadd.f32 %v1756_v0, %v570_v22  ;;  %v641_v36 = vadd.f32 %v1756_v0, %v571_v49  ;;  %v642_v25 = vadd.f32 %v1756_v0, %v572_v52  ;;  %v643_v28 = vadd.f32 %v1756_v0, %v573_v23 }
 0x148   :  { %v700_v7 = vmax.f32 %v636_v55, 0.0  ;;  %v701_v31 = vmax.f32 %v637_v58, 0.0  ;;  %v702_v34 = vmax.f32 %v638_v29, 0.0  ;;  %v703_v10 = vmax.f32 %v639_v11, 0.0 }
 0x149   :  { %v704_v50 = vmax.f32 %v640_v2, 0.0  ;;  %v705_v1 = vmax.f32 %v641_v36, 0.0  ;;  %v706_v24 = vmax.f32 %v642_v25, 0.0  ;;  %v707_v3 = vmax.f32 %v643_v28, 0.0 }
 0x14a   :  { %764 = vst.msk [vmem:[%s2265_s3 + $0x80] sm:$0xff] %vm80_vm0, %v700_v7  ;;  %765 = vst.msk [vmem:[%s2265_s3 + $0x88] sm:$0xff] %vm80_vm0, %v701_v31  ;;  %v504_v5 = vmul.f32 %v1738_v9, %v1452_v61  ;;  %v505_v59 = vmul.f32 %v1738_v9, %v1459_v4  ;;  %v506_v54 = vmul.f32 %v1738_v9, %v1466_v8 }
 0x14b   :  { %766 = vst.msk [vmem:[%s2265_s3 + $0x90] sm:$0xff] %vm80_vm0, %v702_v34  ;;  %767 = vst.msk [vmem:[%s2265_s3 + $0x98] sm:$0xff] %vm80_vm0, %v703_v10  ;;  %v507_v32 = vmul.f32 %v1738_v9, %v1473_v12  ;;  %v508_v61 = vmul.f32 %v1738_v9, %v1480_v17  ;;  %v509_v4 = vmul.f32 %v1738_v9, %v1487_v21 }
 0x14c   :  { %768 = vst.msk [vmem:[%s2265_s3 + $0xa0] sm:$0xff] %vm80_vm0, %v704_v50  ;;  %769 = vst.msk [vmem:[%s2265_s3 + $0xa8] sm:$0xff] %vm80_vm0, %v705_v1  ;;  %v510_v8 = vmul.f32 %v1738_v9, %v1494_v26  ;;  %v511_v12 = vmul.f32 %v1738_v9, %v1501_v30  ;;  %v574_v47 = vmul.f32 %v1743_v45, %v504_v5 }
 0x14d   :  { %770 = vst.msk [vmem:[%s2265_s3 + $0xb0] sm:$0xff] %vm80_vm0, %v706_v24  ;;  %771 = vst.msk [vmem:[%s2265_s3 + $0xb8] sm:$0xff] %vm80_vm0, %v707_v3  ;;  %v575_v41 = vmul.f32 %v1743_v45, %v505_v59  ;;  %v576_v42 = vmul.f32 %v1743_v45, %v506_v54  ;;  %v577_v18 = vmul.f32 %v1743_v45, %v507_v32 }
 0x14e   :  { %v578_v56 = vmul.f32 %v1743_v45, %v508_v61  ;;  %v579_v17 = vmul.f32 %v1743_v45, %v509_v4  ;;  %v580_v21 = vmul.f32 %v1743_v45, %v510_v8  ;;  %v581_v51 = vmul.f32 %v1743_v45, %v511_v12 }
 0x14f   :  { %v644_v26 = vadd.f32 %v1756_v0, %v574_v47  ;;  %v645_v30 = vadd.f32 %v1756_v0, %v575_v41  ;;  %v646_v63 = vadd.f32 %v1756_v0, %v576_v42  ;;  %v647_v60 = vadd.f32 %v1756_v0, %v577_v18  ;;  %v2353_v18 = vld [vmem:[#allocation19_spill] sm:$0xff] }
 0x150   :  { %v648_v15 = vadd.f32 %v1756_v0, %v578_v56  ;;  %v649_v37 = vadd.f32 %v1756_v0, %v579_v17  ;;  %v650_v40 = vadd.f32 %v1756_v0, %v580_v21  ;;  %v651_v43 = vadd.f32 %v1756_v0, %v581_v51  ;;  %v2354_v17 = vld [vmem:[#allocation20_spill] sm:$0xff] }
 0x151   :  { %v708_v46 = vmax.f32 %v644_v26, 0.0  ;;  %v709_v13 = vmax.f32 %v645_v30, 0.0  ;;  %v710_v38 = vmax.f32 %v646_v63, 0.0  ;;  %v711_v16 = vmax.f32 %v647_v60, 0.0 }
 0x152   :  { %v712_v19 = vmax.f32 %v648_v15, 0.0  ;;  %v713_v22 = vmax.f32 %v649_v37, 0.0  ;;  %v714_v49 = vmax.f32 %v650_v40, 0.0  ;;  %v715_v52 = vmax.f32 %v651_v43, 0.0 }
 0x153   :  { %772 = vst.msk [vmem:[%s2265_s3 + $0xc0] sm:$0xff] %vm80_vm0, %v708_v46  ;;  %773 = vst.msk [vmem:[%s2265_s3 + $0xc8] sm:$0xff] %vm80_vm0, %v709_v13  ;;  %v512_v23 = vmul.f32 %v1738_v9, %v1508_v35  ;;  %v513_v55 = vmul.f32 %v1738_v9, %v1515_v39  ;;  %v514_v58 = vmul.f32 %v1738_v9, %v1522_v44 }
 0x154   :  { %774 = vst.msk [vmem:[%s2265_s3 + $0xd0] sm:$0xff] %vm80_vm0, %v710_v38  ;;  %775 = vst.msk [vmem:[%s2265_s3 + $0xd8] sm:$0xff] %vm80_vm0, %v711_v16  ;;  %v515_v29 = vmul.f32 %v1738_v9, %v1529_v48  ;;  %v516_v35 = vmul.f32 %v1738_v9, %v1536_v53  ;;  %v517_v39 = vmul.f32 %v1738_v9, %v1543_v57 }
 0x155   :  { %776 = vst.msk [vmem:[%s2265_s3 + $0xe0] sm:$0xff] %vm80_vm0, %v712_v19  ;;  %777 = vst.msk [vmem:[%s2265_s3 + $0xe8] sm:$0xff] %vm80_vm0, %v713_v22  ;;  %v518_v44 = vmul.f32 %v1738_v9, %v1550_v62  ;;  %v519_v48 = vmul.f32 %v1738_v9, %v1557_v6  ;;  %v582_v11 = vmul.f32 %v1743_v45, %v512_v23 }
 0x156   :  { %778 = vst.msk [vmem:[%s2265_s3 + $0xf0] sm:$0xff] %vm80_vm0, %v714_v49  ;;  %779 = vst.msk [vmem:[%s2265_s3 + $0xf8] sm:$0xff] %vm80_vm0, %v715_v52  ;;  %v583_v2 = vmul.f32 %v1743_v45, %v513_v55  ;;  %v584_v36 = vmul.f32 %v1743_v45, %v514_v58  ;;  %v585_v25 = vmul.f32 %v1743_v45, %v515_v29 }
 0x157   :  { %v586_v28 = vmul.f32 %v1743_v45, %v516_v35  ;;  %v587_v53 = vmul.f32 %v1743_v45, %v517_v39  ;;  %v588_v57 = vmul.f32 %v1743_v45, %v518_v44  ;;  %v589_v7 = vmul.f32 %v1743_v45, %v519_v48  ;;  %v2355_v48 = vld [vmem:[#allocation21_spill] sm:$0xff] }
 0x158   :  { %v652_v62 = vadd.f32 %v1756_v0, %v582_v11  ;;  %v653_v6 = vadd.f32 %v1756_v0, %v583_v2  ;;  %v654_v31 = vadd.f32 %v1756_v0, %v584_v36  ;;  %v655_v34 = vadd.f32 %v1756_v0, %v585_v25  ;;  %v2356_v2 = vld [vmem:[#allocation2_spill] sm:$0xff]  ;;  %v2357_v25 = vld [vmem:[#allocation3_spill] sm:$0xff] }
 0x159   :  { %v656_v10 = vadd.f32 %v1756_v0, %v586_v28  ;;  %v657_v50 = vadd.f32 %v1756_v0, %v587_v53  ;;  %v658_v1 = vadd.f32 %v1756_v0, %v588_v57  ;;  %v659_v24 = vadd.f32 %v1756_v0, %v589_v7  ;;  %v2358_v53 = vld [vmem:[#allocation4_spill] sm:$0xff]  ;;  %v2359_v7 = vld [vmem:[#allocation5_spill] sm:$0xff] }
 0x15a   :  { %v716_v3 = vmax.f32 %v652_v62, 0.0  ;;  %v717_v5 = vmax.f32 %v653_v6, 0.0  ;;  %v718_v59 = vmax.f32 %v654_v31, 0.0  ;;  %v719_v54 = vmax.f32 %v655_v34, 0.0  ;;  %v2360_v6 = vld [vmem:[#allocation6_spill] sm:$0xff]  ;;  %v2361_v34 = vld [vmem:[#allocation7_spill] sm:$0xff] }
 0x15b   :  { %v720_v32 = vmax.f32 %v656_v10, 0.0  ;;  %v721_v61 = vmax.f32 %v657_v50, 0.0  ;;  %v722_v4 = vmax.f32 %v658_v1, 0.0  ;;  %v723_v8 = vmax.f32 %v659_v24, 0.0  ;;  %v2362_v50 = vld [vmem:[#allocation8_spill] sm:$0xff] }
 0x15c   :  { %780 = vst.msk [vmem:[%s2265_s3 + $0x100] sm:$0xff] %vm80_vm0, %v716_v3  ;;  %781 = vst.msk [vmem:[%s2265_s3 + $0x108] sm:$0xff] %vm80_vm0, %v717_v5  ;;  %v520_v12 = vmul.f32 %v1738_v9, %v1564_v14  ;;  %v521_v47 = vmul.f32 %v1738_v9, %v1571_v20  ;;  %v522_v41 = vmul.f32 %v1738_v9, %v1578_v27  ;;  %v2351_v14 = vld [vmem:[#allocation17_spill] sm:$0xff]  ;;  %v2352_v27 = vld [vmem:[#allocation18_spill] sm:$0xff] }
 0x15d   :  { %782 = vst.msk [vmem:[%s2265_s3 + $0x110] sm:$0xff] %vm80_vm0, %v718_v59  ;;  %783 = vst.msk [vmem:[%s2265_s3 + $0x118] sm:$0xff] %vm80_vm0, %v719_v54  ;;  %v523_v42 = vmul.f32 %v1738_v9, %v1585_v33  ;;  %v524_v20 = vmul.f32 %v1738_v9, %v2351_v14  ;;  %v525_v33 = vmul.f32 %v1738_v9, %v2352_v27 }
 0x15e   :  { %784 = vst.msk [vmem:[%s2265_s3 + $0x120] sm:$0xff] %vm80_vm0, %v720_v32  ;;  %785 = vst.msk [vmem:[%s2265_s3 + $0x128] sm:$0xff] %vm80_vm0, %v721_v61  ;;  %v526_v56 = vmul.f32 %v1738_v9, %v2353_v18  ;;  %v527_v21 = vmul.f32 %v1738_v9, %v2354_v17  ;;  %v590_v51 = vmul.f32 %v1743_v45, %v520_v12 }
 0x15f   :  { %786 = vst.msk [vmem:[%s2265_s3 + $0x130] sm:$0xff] %vm80_vm0, %v722_v4  ;;  %787 = vst.msk [vmem:[%s2265_s3 + $0x138] sm:$0xff] %vm80_vm0, %v723_v8  ;;  %v591_v26 = vmul.f32 %v1743_v45, %v521_v47  ;;  %v592_v30 = vmul.f32 %v1743_v45, %v522_v41  ;;  %v593_v63 = vmul.f32 %v1743_v45, %v523_v42 }
 0x160   :  { %v594_v60 = vmul.f32 %v1743_v45, %v524_v20  ;;  %v595_v15 = vmul.f32 %v1743_v45, %v525_v33  ;;  %v596_v37 = vmul.f32 %v1743_v45, %v526_v56  ;;  %v597_v40 = vmul.f32 %v1743_v45, %v527_v21 }
 0x161   :  { %v660_v43 = vadd.f32 %v1756_v0, %v590_v51  ;;  %v661_v46 = vadd.f32 %v1756_v0, %v591_v26  ;;  %v662_v13 = vadd.f32 %v1756_v0, %v592_v30  ;;  %v663_v38 = vadd.f32 %v1756_v0, %v593_v63  ;;  %v2363_v63 = vld [vmem:[#allocation9_spill] sm:$0xff] }
 0x162   :  { %v664_v16 = vadd.f32 %v1756_v0, %v594_v60  ;;  %v665_v19 = vadd.f32 %v1756_v0, %v595_v15  ;;  %v666_v22 = vadd.f32 %v1756_v0, %v596_v37  ;;  %v667_v49 = vadd.f32 %v1756_v0, %v597_v40  ;;  %v2364_v15 = vld [vmem:[#allocation10_spill] sm:$0xff]  ;;  %v2365_v40 = vld [vmem:[#allocation11_spill] sm:$0xff] }
 0x163   :  { %v724_v52 = vmax.f32 %v660_v43, 0.0  ;;  %v725_v23 = vmax.f32 %v661_v46, 0.0  ;;  %v726_v55 = vmax.f32 %v662_v13, 0.0  ;;  %v727_v58 = vmax.f32 %v663_v38, 0.0  ;;  %v2366_v46 = vld [vmem:[#allocation12_spill] sm:$0xff]  ;;  %v2367_v38 = vld [vmem:[#allocation13_spill] sm:$0xff] }
 0x164   :  { %v728_v29 = vmax.f32 %v664_v16, 0.0  ;;  %v729_v35 = vmax.f32 %v665_v19, 0.0  ;;  %v730_v39 = vmax.f32 %v666_v22, 0.0  ;;  %v731_v44 = vmax.f32 %v667_v49, 0.0  ;;  %v2368_v19 = vld [vmem:[#allocation14_spill] sm:$0xff]  ;;  %v2369_v49 = vld [vmem:[#allocation15_spill] sm:$0xff] }
 0x165   :  { %788 = vst.msk [vmem:[%s2265_s3 + $0x140] sm:$0xff] %vm80_vm0, %v724_v52  ;;  %789 = vst.msk [vmem:[%s2265_s3 + $0x148] sm:$0xff] %vm80_vm0, %v725_v23  ;;  %v528_v11 = vmul.f32 %v1738_v9, %v2355_v48  ;;  %v529_v36 = vmul.f32 %v1738_v9, %v2356_v2  ;;  %v530_v28 = vmul.f32 %v1738_v9, %v2357_v25  ;;  %v2370_v23 = vld [vmem:[#allocation22_spill] sm:$0xff] }
 0x166   :  { %790 = vst.msk [vmem:[%s2265_s3 + $0x150] sm:$0xff] %vm80_vm0, %v726_v55  ;;  %791 = vst.msk [vmem:[%s2265_s3 + $0x158] sm:$0xff] %vm80_vm0, %v727_v58  ;;  %v531_v57 = vmul.f32 %v1738_v9, %v2358_v53  ;;  %v532_v62 = vmul.f32 %v1738_v9, %v2359_v7  ;;  %v533_v31 = vmul.f32 %v1738_v9, %v2360_v6 }
 0x167   :  { %792 = vst.msk [vmem:[%s2265_s3 + $0x160] sm:$0xff] %vm80_vm0, %v728_v29  ;;  %793 = vst.msk [vmem:[%s2265_s3 + $0x168] sm:$0xff] %vm80_vm0, %v729_v35  ;;  %v534_v10 = vmul.f32 %v1738_v9, %v2361_v34  ;;  %v535_v1 = vmul.f32 %v1738_v9, %v2362_v50  ;;  %v598_v24 = vmul.f32 %v1743_v45, %v528_v11 }
 0x168   :  { %794 = vst.msk [vmem:[%s2265_s3 + $0x170] sm:$0xff] %vm80_vm0, %v730_v39  ;;  %795 = vst.msk [vmem:[%s2265_s3 + $0x178] sm:$0xff] %vm80_vm0, %v731_v44  ;;  %v599_v3 = vmul.f32 %v1743_v45, %v529_v36  ;;  %v600_v5 = vmul.f32 %v1743_v45, %v530_v28  ;;  %v601_v59 = vmul.f32 %v1743_v45, %v531_v57 }
 0x169   :  { %v602_v54 = vmul.f32 %v1743_v45, %v532_v62  ;;  %v603_v32 = vmul.f32 %v1743_v45, %v533_v31  ;;  %v604_v61 = vmul.f32 %v1743_v45, %v534_v10  ;;  %v605_v4 = vmul.f32 %v1743_v45, %v535_v1 }
 0x16a   :  { %v668_v8 = vadd.f32 %v1756_v0, %v598_v24  ;;  %v669_v12 = vadd.f32 %v1756_v0, %v599_v3  ;;  %v670_v47 = vadd.f32 %v1756_v0, %v600_v5  ;;  %v671_v41 = vadd.f32 %v1756_v0, %v601_v59 }
 0x16b   :  { %v672_v42 = vadd.f32 %v1756_v0, %v602_v54  ;;  %v673_v14 = vadd.f32 %v1756_v0, %v603_v32  ;;  %v674_v20 = vadd.f32 %v1756_v0, %v604_v61  ;;  %v675_v27 = vadd.f32 %v1756_v0, %v605_v4 }
 0x16c   :  { %v732_v33 = vmax.f32 %v668_v8, 0.0  ;;  %v733_v18 = vmax.f32 %v669_v12, 0.0  ;;  %v734_v56 = vmax.f32 %v670_v47, 0.0  ;;  %v735_v17 = vmax.f32 %v671_v41, 0.0 }
 0x16d   :  { %v736_v21 = vmax.f32 %v672_v42, 0.0  ;;  %v737_v51 = vmax.f32 %v673_v14, 0.0  ;;  %v738_v26 = vmax.f32 %v674_v20, 0.0  ;;  %v739_v30 = vmax.f32 %v675_v27, 0.0 }
 0x16e   :  { %796 = vst.msk [vmem:[%s2265_s3 + $0x180] sm:$0xff] %vm80_vm0, %v732_v33  ;;  %797 = vst.msk [vmem:[%s2265_s3 + $0x188] sm:$0xff] %vm80_vm0, %v733_v18  ;;  %v536_v60 = vmul.f32 %v1738_v9, %v2363_v63  ;;  %v537_v37 = vmul.f32 %v1738_v9, %v2364_v15  ;;  %v538_v43 = vmul.f32 %v1738_v9, %v2365_v40 }
 0x16f   :  { %798 = vst.msk [vmem:[%s2265_s3 + $0x190] sm:$0xff] %vm80_vm0, %v734_v56  ;;  %799 = vst.msk [vmem:[%s2265_s3 + $0x198] sm:$0xff] %vm80_vm0, %v735_v17  ;;  %v539_v13 = vmul.f32 %v1738_v9, %v2366_v46  ;;  %v540_v16 = vmul.f32 %v1738_v9, %v2367_v38  ;;  %v541_v22 = vmul.f32 %v1738_v9, %v2368_v19 }
 0x170   :  { %800 = vst.msk [vmem:[%s2265_s3 + $0x1a0] sm:$0xff] %vm80_vm0, %v736_v21  ;;  %801 = vst.msk [vmem:[%s2265_s3 + $0x1a8] sm:$0xff] %vm80_vm0, %v737_v51  ;;  %v542_v52 = vmul.f32 %v1738_v9, %v2369_v49  ;;  %v543_v55 = vmul.f32 %v1738_v9, %v2370_v23  ;;  %v606_v58 = vmul.f32 %v1743_v45, %v536_v60 }
 0x171   :  { %802 = vst.msk [vmem:[%s2265_s3 + $0x1b0] sm:$0xff] %vm80_vm0, %v738_v26  ;;  %803 = vst.msk [vmem:[%s2265_s3 + $0x1b8] sm:$0xff] %vm80_vm0, %v739_v30  ;;  %v607_v29 = vmul.f32 %v1743_v45, %v537_v37  ;;  %v608_v35 = vmul.f32 %v1743_v45, %v538_v43  ;;  %v609_v39 = vmul.f32 %v1743_v45, %v539_v13 }
 0x172   :  { %v610_v44 = vmul.f32 %v1743_v45, %v540_v16  ;;  %v611_v48 = vmul.f32 %v1743_v45, %v541_v22  ;;  %v612_v11 = vmul.f32 %v1743_v45, %v542_v52  ;;  %v613_v2 = vmul.f32 %v1743_v45, %v543_v55 }
 0x173   :  { %v676_v36 = vadd.f32 %v1756_v0, %v606_v58  ;;  %v677_v9 = vadd.f32 %v1756_v0, %v607_v29  ;;  %v678_v25 = vadd.f32 %v1756_v0, %v608_v35  ;;  %v679_v28 = vadd.f32 %v1756_v0, %v609_v39 }
 0x174   :  { %v680_v53 = vadd.f32 %v1756_v0, %v610_v44  ;;  %v681_v57 = vadd.f32 %v1756_v0, %v611_v48  ;;  %v682_v7 = vadd.f32 %v1756_v0, %v612_v11  ;;  %v683_v62 = vadd.f32 %v1756_v0, %v613_v2 }
 0x175   :  { %v740_v6 = vmax.f32 %v676_v36, 0.0  ;;  %v741_v31 = vmax.f32 %v677_v9, 0.0  ;;  %v742_v34 = vmax.f32 %v678_v25, 0.0  ;;  %v743_v45 = vmax.f32 %v679_v28, 0.0 }
 0x176   :  { %v744_v10 = vmax.f32 %v680_v53, 0.0  ;;  %v745_v50 = vmax.f32 %v681_v57, 0.0  ;;  %v746_v1 = vmax.f32 %v682_v7, 0.0  ;;  %v747_v24 = vmax.f32 %v683_v62, 0.0 }
 0x177   :  { %804 = vst.msk [vmem:[%s2265_s3 + $0x1c0] sm:$0xff] %vm80_vm0, %v740_v6  ;;  %805 = vst.msk [vmem:[%s2265_s3 + $0x1c8] sm:$0xff] %vm80_vm0, %v741_v31 }
 0x178   :  { %806 = vst.msk [vmem:[%s2265_s3 + $0x1d0] sm:$0xff] %vm80_vm0, %v742_v34  ;;  %807 = vst.msk [vmem:[%s2265_s3 + $0x1d8] sm:$0xff] %vm80_vm0, %v743_v45 }
 0x179   :  { %808 = vst.msk [vmem:[%s2265_s3 + $0x1e0] sm:$0xff] %vm80_vm0, %v744_v10  ;;  %809 = vst.msk [vmem:[%s2265_s3 + $0x1e8] sm:$0xff] %vm80_vm0, %v745_v50 }
 0x17a   :  { %810 = vst.msk [vmem:[%s2265_s3 + $0x1f0] sm:$0xff] %vm80_vm0, %v746_v1  ;;  %811 = vst.msk [vmem:[%s2265_s3 + $0x1f8] sm:$0xff] %vm80_vm0, %v747_v24 }

// kernel: stem_forward.5
= control target key start
LH: loop header
LB: loop body
LE: loop exit
PB: predicated region body
PF: predicated region fallthrough
CT: control target
= control target key end

     0   :  { %vm305_vm0 = vcmask 523264   ;;  %s867_s0 = inlined_call_operand.vmem [shape: f32[128,64], index: 0, kind: input, shape index: {}]   ;;  %s868_s1 = inlined_call_operand.vmem [shape: f32[128,64], index: 1, kind: input, shape index: {}]   ;;  %s869_s2 = inlined_call_operand.vmem [shape: f32[128,64], index: 2, kind: input, shape index: {}]   ;;  %s870_s3 = inlined_call_operand.vmem [shape: f32[128,64], index: 3, kind: input, shape index: {}]   ;;  %s871_s4 = inlined_call_operand.vmem [shape: f32[128,64], index: 4, kind: input, shape index: {}]   ;;  %s872_s5 = inlined_call_operand.vmem [shape: f32[128,64], index: 5, kind: input, shape index: {}]   ;;  %s873_s6 = inlined_call_operand.vmem [shape: f32[128,64], index: 6, kind: input, shape index: {}]   ;;  %s874_s7 = inlined_call_operand.vmem [shape: f32[128,64], index: 7, kind: input, shape index: {}]   ;;  %s875_s8 = inlined_call_operand.vmem [shape: f32[128,64], index: 8, kind: input, shape index: {}]   ;;  %s876_s9 = inlined_call_operand.hbm [shape: f32[128,64], index: 9, kind: output, shape index: {}]  }
   0x1   :  { %v33_v0 = vld [vmem:[%s867_s0] sm:$0xff]  ;;  %v34_v6 = vld [vmem:[%s867_s0 + $0x8] sm:$0xff]  ;;  %v35_v15 = vld [vmem:[%s867_s0 + $0x10] sm:$0xff] }
   0x2   :  { %v49_v1 = vld [vmem:[%s868_s1] sm:$0xff]  ;;  %v50_v7 = vld [vmem:[%s868_s1 + $0x8] sm:$0xff]  ;;  %v51_v16 = vld [vmem:[%s868_s1 + $0x10] sm:$0xff] }
   0x3   :  { %v81_v2 = vld [vmem:[%s869_s2] sm:$0xff]  ;;  %v65_v3 = vmax.f32 %v33_v0, %v49_v1  ;;  %v82_v8 = vld [vmem:[%s869_s2 + $0x8] sm:$0xff]  ;;  %v66_v10 = vmax.f32 %v34_v6, %v50_v7  ;;  %v83_v17 = vld [vmem:[%s869_s2 + $0x10] sm:$0xff]  ;;  %v67_v20 = vmax.f32 %v35_v15, %v51_v16 }
   0x4   :  { %v113_v4 = vld [vmem:[%s870_s3] sm:$0xff]  ;;  %v114_v13 = vld [vmem:[%s870_s3 + $0x8] sm:$0xff]  ;;  %v115_v24 = vld [vmem:[%s870_s3 + $0x10] sm:$0xff] }
   0x5   :  { %v97_v5 = vmax.f32 %v65_v3, %v81_v2  ;;  %v145_v9 = vld [vmem:[%s871_s4] sm:$0xff]  ;;  %v98_v14 = vmax.f32 %v66_v10, %v82_v8  ;;  %v146_v19 = vld [vmem:[%s871_s4 + $0x8] sm:$0xff]  ;;  %v99_v26 = vmax.f32 %v67_v20, %v83_v17  ;;  %v36_v27 = vld [vmem:[%s867_s0 + $0x18] sm:$0xff] }
   0x6   :  { %v177_v12 = vld [vmem:[%s872_s5] sm:$0xff]  ;;  %v178_v23 = vld [vmem:[%s872_s5 + $0x8] sm:$0xff]  ;;  %v52_v28 = vld [vmem:[%s868_s1 + $0x18] sm:$0xff] }
   0x7   :  { %v129_v11 = vmax.f32 %v97_v5, %v113_v4  ;;  %v209_v21 = vld [vmem:[%s873_s6] sm:$0xff]  ;;  %v130_v22 = vmax.f32 %v98_v14, %v114_v13  ;;  %v84_v29 = vld [vmem:[%s869_s2 + $0x18] sm:$0xff]  ;;  %v147_v33 = vld [vmem:[%s871_s4 + $0x10] sm:$0xff]  ;;  %v68_v34 = vmax.f32 %v36_v27, %v52_v28  ;;  %v131_v37 = vmax.f32 %v99_v26, %v115_v24 }
   0x8   :  { %v241_v30 = vld [vmem:[%s874_s7] sm:$0xff]  ;;  %v210_v36 = vld [vmem:[%s873_s6 + $0x8] sm:$0xff]  ;;  %v179_v38 = vld [vmem:[%s872_s5 + $0x10] sm:$0xff] }
   0x9   :  { %v161_v18 = vmax.f32 %v129_v11, %v145_v9  ;;  %v273_v31 = vld [vmem:[%s875_s8] sm:$0xff]  ;;  %v162_v32 = vmax.f32 %v130_v22, %v146_v19  ;;  %v116_v39 = vld [vmem:[%s870_s3 + $0x18] sm:$0xff]  ;;  %v100_v41 = vmax.f32 %v68_v34, %v84_v29  ;;  %v242_v46 = vld [vmem:[%s874_s7 + $0x8] sm:$0xff]  ;;  %v163_v48 = vmax.f32 %v131_v37, %v147_v33 }
   0xa   :  { %v37_v42 = vld [vmem:[%s867_s0 + $0x20] sm:$0xff]  ;;  %v274_v47 = vld [vmem:[%s875_s8 + $0x8] sm:$0xff]  ;;  %v148_v49 = vld [vmem:[%s871_s4 + $0x18] sm:$0xff] }
   0xb   :  { %v193_v25 = vmax.f32 %v161_v18, %v177_v12  ;;  %v194_v40 = vmax.f32 %v162_v32, %v178_v23  ;;  %v53_v43 = vld [vmem:[%s868_s1 + $0x20] sm:$0xff]  ;;  %v211_v52 = vld [vmem:[%s873_s6 + $0x10] sm:$0xff]  ;;  %v132_v53 = vmax.f32 %v100_v41, %v116_v39  ;;  %v180_v54 = vld [vmem:[%s872_s5 + $0x18] sm:$0xff]  ;;  %v195_v57 = vmax.f32 %v163_v48, %v179_v38 }
   0xc   :  { %v85_v44 = vld [vmem:[%s869_s2 + $0x20] sm:$0xff]  ;;  %v69_v50 = vmax.f32 %v37_v42, %v53_v43  ;;  %v38_v59 = vld [vmem:[%s867_s0 + $0x28] sm:$0xff]  ;;  %v243_v63 = vld [vmem:[%s874_s7 + $0x10] sm:$0xff] }
   0xd   :  { %v225_v35 = vmax.f32 %v193_v25, %v209_v21  ;;  %v226_v51 = vmax.f32 %v194_v40, %v210_v36  ;;  %v117_v55 = vld [vmem:[%s870_s3 + $0x20] sm:$0xff]  ;;  %v54_v60 = vld [vmem:[%s868_s1 + $0x28] sm:$0xff]  ;;  %v275_v0 = vld [vmem:[%s875_s8 + $0x10] sm:$0xff]  ;;  %v164_v1 = vmax.f32 %v132_v53, %v148_v49  ;;  %v227_v4 = vmax.f32 %v195_v57, %v211_v52 }
   0xe   :  { %v101_v58 = vmax.f32 %v69_v50, %v85_v44  ;;  %v86_v61 = vld [vmem:[%s869_s2 + $0x28] sm:$0xff]  ;;  %v149_v2 = vld [vmem:[%s871_s4 + $0x20] sm:$0xff]  ;;  %v70_v3 = vmax.f32 %v38_v59, %v54_v60  ;;  %v212_v5 = vld [vmem:[%s873_s6 + $0x18] sm:$0xff] }
   0xf   :  { %v257_v45 = vmax.f32 %v225_v35, %v241_v30  ;;  %v258_v62 = vmax.f32 %v226_v51, %v242_v46  ;;  %v181_v7 = vld [vmem:[%s872_s5 + $0x20] sm:$0xff]  ;;  %v118_v8 = vld [vmem:[%s870_s3 + $0x28] sm:$0xff]  ;;  %v196_v10 = vmax.f32 %v164_v1, %v180_v54  ;;  %v39_v12 = vld [vmem:[%s867_s0 + $0x30] sm:$0xff]  ;;  %v259_v15 = vmax.f32 %v227_v4, %v243_v63 }
  0x10   :  { %v133_v6 = vmax.f32 %v101_v58, %v117_v55  ;;  %v102_v11 = vmax.f32 %v70_v3, %v86_v61  ;;  %v55_v13 = vld [vmem:[%s868_s1 + $0x30] sm:$0xff]  ;;  %v244_v16 = vld [vmem:[%s874_s7 + $0x18] sm:$0xff]  ;;  %v150_v19 = vld [vmem:[%s871_s4 + $0x28] sm:$0xff] }
  0x11   :  { %v289_v56 = vmax.f32 %v257_v45, %v273_v31  ;;  %v290_v9 = vmax.f32 %v258_v62, %v274_v47  ;;  %v87_v14 = vld [vmem:[%s869_s2 + $0x30] sm:$0xff]  ;;  %v276_v17 = vld [vmem:[%s875_s8 + $0x18] sm:$0xff]  ;;  %v71_v20 = vmax.f32 %v39_v12, %v55_v13  ;;  %v228_v21 = vmax.f32 %v196_v10, %v212_v5  ;;  %v213_v22 = vld [vmem:[%s873_s6 + $0x20] sm:$0xff] }
  0x12   :  { %v165_v18 = vmax.f32 %v133_v6, %v149_v2  ;;  %v134_v23 = vmax.f32 %v102_v11, %v118_v8  ;;  %v182_v24 = vld [vmem:[%s872_s5 + $0x28] sm:$0xff]  ;;  %v119_v25 = vld [vmem:[%s870_s3 + $0x30] sm:$0xff]  ;;  %v291_v26 = vmax.f32 %v259_v15, %v275_v0  ;;  %v40_v29 = vld [vmem:[%s867_s0 + $0x38] sm:$0xff] }
  0x13   :  { %306 = vst.msk [vmem:[#allocation2] sm:$0xff] %vm305_vm0, %v289_v56  ;;  %307 = vst.msk [vmem:[#allocation2 + $0x8] sm:$0xff] %vm305_vm0, %v290_v9  ;;  %v103_v28 = vmax.f32 %v71_v20, %v87_v14  ;;  %v56_v30 = vld [vmem:[%s868_s1 + $0x38] sm:$0xff]  ;;  %v260_v32 = vmax.f32 %v228_v21, %v244_v16  ;;  %v245_v33 = vld [vmem:[%s874_s7 + $0x20] sm:$0xff] }
  0x14   :  { %v197_v27 = vmax.f32 %v165_v18, %v181_v7  ;;  %v88_v31 = vld [vmem:[%s869_s2 + $0x38] sm:$0xff]  ;;  %v277_v34 = vld [vmem:[%s875_s8 + $0x20] sm:$0xff]  ;;  %v166_v35 = vmax.f32 %v134_v23, %v150_v19  ;;  %v151_v36 = vld [vmem:[%s871_s4 + $0x30] sm:$0xff]  ;;  %v72_v37 = vmax.f32 %v40_v29, %v56_v30  ;;  %308 = vst.msk [vmem:[#allocation2 + $0x10] sm:$0xff] %vm305_vm0, %v291_v26 }
  0x15   :  { %v214_v39 = vld [vmem:[%s873_s6 + $0x28] sm:$0xff]  ;;  %v135_v40 = vmax.f32 %v103_v28, %v119_v25  ;;  %v183_v41 = vld [vmem:[%s872_s5 + $0x30] sm:$0xff]  ;;  %v120_v42 = vld [vmem:[%s870_s3 + $0x38] sm:$0xff]  ;;  %v292_v43 = vmax.f32 %v260_v32, %v276_v17 }
  0x16   :  { %v229_v38 = vmax.f32 %v197_v27, %v213_v22  ;;  %v198_v44 = vmax.f32 %v166_v35, %v182_v24  ;;  %v104_v45 = vmax.f32 %v72_v37, %v88_v31  ;;  %v41_v46 = vld [vmem:[%s867_s0 + $0x40] sm:$0xff]  ;;  %v246_v50 = vld [vmem:[%s874_s7 + $0x28] sm:$0xff]  ;;  %v152_v53 = vld [vmem:[%s871_s4 + $0x38] sm:$0xff] }
  0x17   :  { %v57_v47 = vld [vmem:[%s868_s1 + $0x40] sm:$0xff]  ;;  %v278_v51 = vld [vmem:[%s875_s8 + $0x28] sm:$0xff]  ;;  %v167_v52 = vmax.f32 %v135_v40, %v151_v36  ;;  %309 = vst.msk [vmem:[#allocation2 + $0x18] sm:$0xff] %vm305_vm0, %v292_v43  ;;  %v215_v56 = vld [vmem:[%s873_s6 + $0x30] sm:$0xff] }
  0x18   :  { %v89_v48 = vld [vmem:[%s869_s2 + $0x40] sm:$0xff]  ;;  %v261_v49 = vmax.f32 %v229_v38, %v245_v33  ;;  %v73_v54 = vmax.f32 %v41_v46, %v57_v47  ;;  %v230_v55 = vmax.f32 %v198_v44, %v214_v39  ;;  %v136_v57 = vmax.f32 %v104_v45, %v120_v42  ;;  %v184_v58 = vld [vmem:[%s872_s5 + $0x38] sm:$0xff]  ;;  %v42_v63 = vld [vmem:[%s867_s0 + $0x48] sm:$0xff] }
  0x19   :  { %v121_v59 = vld [vmem:[%s870_s3 + $0x40] sm:$0xff]  ;;  %v199_v61 = vmax.f32 %v167_v52, %v183_v41  ;;  %v58_v0 = vld [vmem:[%s868_s1 + $0x48] sm:$0xff]  ;;  %v247_v3 = vld [vmem:[%s874_s7 + $0x30] sm:$0xff] }
  0x1a   :  { %v293_v60 = vmax.f32 %v261_v49, %v277_v34  ;;  %v105_v62 = vmax.f32 %v73_v54, %v89_v48  ;;  %v90_v1 = vld [vmem:[%s869_s2 + $0x48] sm:$0xff]  ;;  %v262_v2 = vmax.f32 %v230_v55, %v246_v50  ;;  %v279_v4 = vld [vmem:[%s875_s8 + $0x30] sm:$0xff]  ;;  %v168_v5 = vmax.f32 %v136_v57, %v152_v53  ;;  %v153_v6 = vld [vmem:[%s871_s4 + $0x40] sm:$0xff] }
  0x1b   :  { %v74_v7 = vmax.f32 %v42_v63, %v58_v0  ;;  %v231_v8 = vmax.f32 %v199_v61, %v215_v56  ;;  %v216_v9 = vld [vmem:[%s873_s6 + $0x38] sm:$0xff]  ;;  %v185_v11 = vld [vmem:[%s872_s5 + $0x40] sm:$0xff]  ;;  %v122_v12 = vld [vmem:[%s870_s3 + $0x48] sm:$0xff] }
  0x1c   :  { %310 = vst.msk [vmem:[#allocation2 + $0x20] sm:$0xff] %vm305_vm0, %v293_v60  ;;  %v137_v10 = vmax.f32 %v105_v62, %v121_v59  ;;  %v294_v13 = vmax.f32 %v262_v2, %v278_v51  ;;  %v200_v14 = vmax.f32 %v168_v5, %v184_v58  ;;  %v43_v16 = vld [vmem:[%s867_s0 + $0x50] sm:$0xff]  ;;  %v248_v20 = vld [vmem:[%s874_s7 + $0x38] sm:$0xff]  ;;  %v154_v23 = vld [vmem:[%s871_s4 + $0x48] sm:$0xff] }
  0x1d   :  { %v106_v15 = vmax.f32 %v74_v7, %v90_v1  ;;  %v59_v17 = vld [vmem:[%s868_s1 + $0x50] sm:$0xff]  ;;  %v263_v19 = vmax.f32 %v231_v8, %v247_v3  ;;  %v280_v21 = vld [vmem:[%s875_s8 + $0x38] sm:$0xff]  ;;  %v217_v26 = vld [vmem:[%s873_s6 + $0x40] sm:$0xff] }
  0x1e   :  { %v91_v18 = vld [vmem:[%s869_s2 + $0x50] sm:$0xff]  ;;  %v169_v22 = vmax.f32 %v137_v10, %v153_v6  ;;  %v75_v24 = vmax.f32 %v43_v16, %v59_v17  ;;  %311 = vst.msk [vmem:[#allocation2 + $0x28] sm:$0xff] %vm305_vm0, %v294_v13  ;;  %v232_v25 = vmax.f32 %v200_v14, %v216_v9  ;;  %v186_v28 = vld [vmem:[%s872_s5 + $0x48] sm:$0xff]  ;;  %v44_v33 = vld [vmem:[%s867_s0 + $0x58] sm:$0xff] }
  0x1f   :  { %v138_v27 = vmax.f32 %v106_v15, %v122_v12  ;;  %v123_v29 = vld [vmem:[%s870_s3 + $0x50] sm:$0xff]  ;;  %v295_v30 = vmax.f32 %v263_v19, %v279_v4  ;;  %v60_v34 = vld [vmem:[%s868_s1 + $0x58] sm:$0xff]  ;;  %v249_v37 = vld [vmem:[%s874_s7 + $0x40] sm:$0xff] }
  0x20   :  { %v201_v31 = vmax.f32 %v169_v22, %v185_v11  ;;  %v107_v32 = vmax.f32 %v75_v24, %v91_v18  ;;  %v92_v35 = vld [vmem:[%s869_s2 + $0x58] sm:$0xff]  ;;  %v264_v36 = vmax.f32 %v232_v25, %v248_v20  ;;  %v281_v38 = vld [vmem:[%s875_s8 + $0x40] sm:$0xff]  ;;  %v155_v40 = vld [vmem:[%s871_s4 + $0x50] sm:$0xff]  ;;  %v76_v41 = vmax.f32 %v44_v33, %v60_v34 }
  0x21   :  { %v170_v39 = vmax.f32 %v138_v27, %v154_v23  ;;  %312 = vst.msk [vmem:[#allocation2 + $0x30] sm:$0xff] %vm305_vm0, %v295_v30  ;;  %v218_v43 = vld [vmem:[%s873_s6 + $0x48] sm:$0xff]  ;;  %v187_v45 = vld [vmem:[%s872_s5 + $0x50] sm:$0xff]  ;;  %v124_v46 = vld [vmem:[%s870_s3 + $0x58] sm:$0xff] }
  0x22   :  { %v233_v42 = vmax.f32 %v201_v31, %v217_v26  ;;  %v139_v44 = vmax.f32 %v107_v32, %v123_v29  ;;  %v296_v47 = vmax.f32 %v264_v36, %v280_v21  ;;  %v108_v49 = vmax.f32 %v76_v41, %v92_v35  ;;  %v45_v50 = vld [vmem:[%s867_s0 + $0x60] sm:$0xff]  ;;  %v250_v54 = vld [vmem:[%s874_s7 + $0x48] sm:$0xff]  ;;  %v156_v57 = vld [vmem:[%s871_s4 + $0x58] sm:$0xff] }
  0x23   :  { %v202_v48 = vmax.f32 %v170_v39, %v186_v28  ;;  %v61_v51 = vld [vmem:[%s868_s1 + $0x60] sm:$0xff]  ;;  %v282_v55 = vld [vmem:[%s875_s8 + $0x48] sm:$0xff]  ;;  %v219_v60 = vld [vmem:[%s873_s6 + $0x50] sm:$0xff] }
  0x24   :  { %v93_v52 = vld [vmem:[%s869_s2 + $0x60] sm:$0xff]  ;;  %v265_v53 = vmax.f32 %v233_v42, %v249_v37  ;;  %v171_v56 = vmax.f32 %v139_v44, %v155_v40  ;;  %v77_v58 = vmax.f32 %v45_v50, %v61_v51  ;;  %313 = vst.msk [vmem:[#allocation2 + $0x38] sm:$0xff] %vm305_vm0, %v296_v47  ;;  %v140_v61 = vmax.f32 %v108_v49, %v124_v46  ;;  %v188_v62 = vld [vmem:[%s872_s5 + $0x58] sm:$0xff]  ;;  %v46_v3 = vld [vmem:[%s867_s0 + $0x68] sm:$0xff] }
  0x25   :  { %v234_v59 = vmax.f32 %v202_v48, %v218_v43  ;;  %v125_v63 = vld [vmem:[%s870_s3 + $0x60] sm:$0xff]  ;;  %v62_v4 = vld [vmem:[%s868_s1 + $0x68] sm:$0xff]  ;;  %v251_v7 = vld [vmem:[%s874_s7 + $0x50] sm:$0xff] }
  0x26   :  { %v297_v0 = vmax.f32 %v265_v53, %v281_v38  ;;  %v203_v1 = vmax.f32 %v171_v56, %v187_v45  ;;  %v109_v2 = vmax.f32 %v77_v58, %v93_v52  ;;  %v94_v5 = vld [vmem:[%s869_s2 + $0x68] sm:$0xff]  ;;  %v283_v8 = vld [vmem:[%s875_s8 + $0x50] sm:$0xff]  ;;  %v172_v9 = vmax.f32 %v140_v61, %v156_v57  ;;  %v157_v10 = vld [vmem:[%s871_s4 + $0x60] sm:$0xff] }
  0x27   :  { %v266_v6 = vmax.f32 %v234_v59, %v250_v54  ;;  %v78_v11 = vmax.f32 %v46_v3, %v62_v4  ;;  %v220_v13 = vld [vmem:[%s873_s6 + $0x58] sm:$0xff]  ;;  %v189_v15 = vld [vmem:[%s872_s5 + $0x60] sm:$0xff]  ;;  %v126_v16 = vld [vmem:[%s870_s3 + $0x68] sm:$0xff] }
  0x28   :  { %314 = vst.msk [vmem:[#allocation2 + $0x40] sm:$0xff] %vm305_vm0, %v297_v0  ;;  %v235_v12 = vmax.f32 %v203_v1, %v219_v60  ;;  %v141_v14 = vmax.f32 %v109_v2, %v125_v63  ;;  %v204_v18 = vmax.f32 %v172_v9, %v188_v62  ;;  %v47_v20 = vld [vmem:[%s867_s0 + $0x70] sm:$0xff]  ;;  %v252_v24 = vld [vmem:[%s874_s7 + $0x58] sm:$0xff]  ;;  %v158_v27 = vld [vmem:[%s871_s4 + $0x68] sm:$0xff] }
  0x29   :  { %v298_v17 = vmax.f32 %v266_v6, %v282_v55  ;;  %v110_v19 = vmax.f32 %v78_v11, %v94_v5  ;;  %v63_v21 = vld [vmem:[%s868_s1 + $0x70] sm:$0xff]  ;;  %v284_v25 = vld [vmem:[%s875_s8 + $0x58] sm:$0xff]  ;;  %v221_v30 = vld [vmem:[%s873_s6 + $0x60] sm:$0xff] }
  0x2a   :  { %v95_v22 = vld [vmem:[%s869_s2 + $0x70] sm:$0xff]  ;;  %v267_v23 = vmax.f32 %v235_v12, %v251_v7  ;;  %v173_v26 = vmax.f32 %v141_v14, %v157_v10  ;;  %v79_v28 = vmax.f32 %v47_v20, %v63_v21  ;;  %v236_v29 = vmax.f32 %v204_v18, %v220_v13  ;;  %v190_v32 = vld [vmem:[%s872_s5 + $0x68] sm:$0xff]  ;;  %v48_v37 = vld [vmem:[%s867_s0 + $0x78] sm:$0xff] }
  0x2b   :  { %315 = vst.msk [vmem:[#allocation2 + $0x48] sm:$0xff] %vm305_vm0, %v298_v17  ;;  %v142_v31 = vmax.f32 %v110_v19, %v126_v16  ;;  %v127_v33 = vld [vmem:[%s870_s3 + $0x70] sm:$0xff]  ;;  %v64_v38 = vld [vmem:[%s868_s1 + $0x78] sm:$0xff]  ;;  %v253_v41 = vld [vmem:[%s874_s7 + $0x60] sm:$0xff] }
  0x2c   :  { %v299_v34 = vmax.f32 %v267_v23, %v283_v8  ;;  %v205_v35 = vmax.f32 %v173_v26, %v189_v15  ;;  %v111_v36 = vmax.f32 %v79_v28, %v95_v22  ;;  %v96_v39 = vld [vmem:[%s869_s2 + $0x78] sm:$0xff]  ;;  %v268_v40 = vmax.f32 %v236_v29, %v252_v24  ;;  %v159_v43 = vld [vmem:[%s871_s4 + $0x70] sm:$0xff]  ;;  %v222_v46 = vld [vmem:[%s873_s6 + $0x68] sm:$0xff] }
  0x2d   :  { %v174_v42 = vmax.f32 %v142_v31, %v158_v27  ;;  %v80_v44 = vmax.f32 %v48_v37, %v64_v38  ;;  %v128_v48 = vld [vmem:[%s870_s3 + $0x78] sm:$0xff]  ;;  %v285_v50 = vld [vmem:[%s875_s8 + $0x60] sm:$0xff]  ;;  %v191_v52 = vld [vmem:[%s872_s5 + $0x70] sm:$0xff] }
  0x2e   :  { %316 = vst.msk [vmem:[#allocation2 + $0x50] sm:$0xff] %vm305_vm0, %v299_v34  ;;  %v237_v45 = vmax.f32 %v205_v35, %v221_v30  ;;  %v143_v47 = vmax.f32 %v111_v36, %v127_v33  ;;  %v300_v49 = vmax.f32 %v268_v40, %v284_v25 }
  0x2f   :  { %v206_v51 = vmax.f32 %v174_v42, %v190_v32  ;;  %v112_v53 = vmax.f32 %v80_v44, %v96_v39 }
  0x30   :  { %14 = vsyncpa [#allocation3], 0  ;;  %v269_v54 = vmax.f32 %v237_v45, %v253_v41  ;;  %v254_v55 = vld [vmem:[%s874_s7 + $0x68] sm:$0xff]  ;;  %v175_v56 = vmax.f32 %v143_v47, %v159_v43  ;;  %v160_v57 = vld [vmem:[%s871_s4 + $0x78] sm:$0xff]  ;;  %317 = vst.msk [vmem:[#allocation2 + $0x58] sm:$0xff] %vm305_vm0, %v300_v49 }
  0x31   :  { %v238_v58 = vmax.f32 %v206_v51, %v222_v46  ;;  %v223_v59 = vld [vmem:[%s873_s6 + $0x70] sm:$0xff]  ;;  %v144_v60 = vmax.f32 %v112_v53, %v128_v48  ;;  %v286_v62 = vld [vmem:[%s875_s8 + $0x68] sm:$0xff]  ;;  %v192_v0 = vld [vmem:[%s872_s5 + $0x78] sm:$0xff] }
  0x32   :  { %v301_v61 = vmax.f32 %v269_v54, %v285_v50  ;;  %v207_v63 = vmax.f32 %v175_v56, %v191_v52  ;;  %v255_v2 = vld [vmem:[%s874_s7 + $0x70] sm:$0xff]  ;;  %v224_v5 = vld [vmem:[%s873_s6 + $0x78] sm:$0xff]  ;;  %s363_s6 = smov [#allocation2]  }
  0x33   :  { %v270_v1 = vmax.f32 %v238_v58, %v254_v55  ;;  %v176_v3 = vmax.f32 %v144_v60, %v160_v57  ;;  %v287_v7 = vld [vmem:[%s875_s8 + $0x70] sm:$0xff]  ;;  %v256_v10 = vld [vmem:[%s874_s7 + $0x78] sm:$0xff]  ;;  %s327_s1 = sshll.u32 %s363_s6, 4  ;;  %s328_s1 = int_to_ptr.vmem [resolvable:$true] %s327_s1 }
  0x34   :  { %318 = vst.msk [vmem:[#allocation2 + $0x60] sm:$0xff] %vm305_vm0, %v301_v61  ;;  %v239_v4 = vmax.f32 %v207_v63, %v223_v59  ;;  %v288_v13 = vld [vmem:[%s875_s8 + $0x78] sm:$0xff]  ;;  %s341_s2 = scalar_lea.vmem %s328_s1, 2048  ;;  %p346_p1 = scmp.lt.s32.totalorder %s328_s1, %s328_s1 }
  0x35   :  { %v302_v6 = vmax.f32 %v270_v1, %v286_v62  ;;  %v208_v8 = vmax.f32 %v176_v3, %v192_v0  ;;  %p342_p0 = scmp.ne.s32.totalorder %s328_s1, %s341_s2  ;;  %p347_p2 = scmp.lt.s32.totalorder %s341_s2, %s341_s2 }
  0x36   :  { %v271_v9 = vmax.f32 %v239_v4, %v255_v2 }
  0x37   :  { %319 = vst.msk [vmem:[#allocation2 + $0x68] sm:$0xff] %vm305_vm0, %v302_v6  ;;  %v240_v11 = vmax.f32 %v208_v8, %v224_v5  ;;  %p348_p3 = por %p347_p2, %p346_p1 }
  0x38   :  { %v303_v12 = vmax.f32 %v271_v9, %v287_v7 }
  0x39   :  { %v272_v14 = vmax.f32 %v240_v11, %v256_v10  ;;  %p349_p4 = pnand %p348_p3, %p342_p0 }
  0x3a   :  { %320 = vst.msk [vmem:[#allocation2 + $0x70] sm:$0xff] %vm305_vm0, %v303_v12 }
  0x3b   :  { %v304_v15 = vmax.f32 %v272_v14, %v288_v13 }
  0x3d   :  { %321 = vst.msk [vmem:[#allocation2 + $0x78] sm:$0xff] %vm305_vm0, %v304_v15 }
  0x3e   :  { %352 = shalt.err (!%p349_p4)
}
  0x3f   :  { %s364_s7 = smov 128   ;;  %s365_s17 = smov 8  }
  0x40   :  { %333 = dma.vmem_to_hbm [thread:$0]  %s328_s1, 2048, %s876_s9, [#allocation3], %s364_s7, %s364_s7, %s365_s17  }
  0x41   :  { %361 = dma.done.wait [#allocation3], 2048  }
  0x42   :  { %362 = vsyncadd [#allocation3], 4294965248 }
  0x43   :  { %337 = vsyncpa [#allocation3], 1 }

</bundles_post_ra>
